<compile_context>
chip_gen: v6e
topology: v6e:2x2x1
jax: 0.10.0
libtpu: 0.0.40
codegen_flags: <defaults>
</compile_context>

<pallas_src>
import functools
import math

import jax
import jax.numpy as jnp
from jax.experimental import pallas as pl
from jax.experimental.pallas import tpu as pltpu

_NEG_INF = -1e30  # finite (not -inf) so exp(m_prev - m_new) stays NaN-free


def _pick_tile(n, candidates):
    """Largest candidate tile dividing n, else the full dim (always legal)."""
    for t in candidates:
        if n % t == 0:
            return t
    return n


# ---------------------------------------------------------------------------
# Linear kernel:  y = x @ W + b   (K-tiled, f32 accumulator)
#   x: (tm, tk) bf16   W: (tk, N) bf16   b: (1, N) f32   y: (tm, N) out_dtype
# ---------------------------------------------------------------------------
def _linear_kernel(x_ref, w_ref, b_ref, o_ref, acc_ref):
    k = pl.program_id(1)

    @pl.when(k == 0)
    def _init():
        acc_ref[...] = jnp.zeros_like(acc_ref)

    acc_ref[...] += jnp.dot(x_ref[...], w_ref[...],
                            preferred_element_type=jnp.float32)

    @pl.when(k == pl.num_programs(1) - 1)
    def _finalize():
        o_ref[...] = (acc_ref[...] + b_ref[...]).astype(o_ref.dtype)


def _linear(x2d, w, b, out_dtype):
    M, K = x2d.shape
    _, N = w.shape
    tm = _pick_tile(M, (1024, 512, 256, 128, 64, 32, 16, 8))
    # Keep the whole weight resident when small (v5e/v6e sweet spot);
    # otherwise tile the contraction so VMEM stays bounded (v7x, huge C).
    if K * N * w.dtype.itemsize <= 16 * 1024 * 1024:
        tk = K
    else:
        tk = _pick_tile(K, (1024, 512, 256, 128))

    b2 = b.reshape(1, N).astype(jnp.float32)
    out_itemsize = jnp.dtype(out_dtype).itemsize

    vmem_bytes = (2 * tm * tk * x2d.dtype.itemsize   # x double buffer
                  + 2 * tk * N * w.dtype.itemsize    # W double buffer
                  + 2 * N * 4                        # bias
                  + 2 * tm * N * out_itemsize        # out double buffer
                  + tm * N * 4                       # f32 accumulator
                  + (4 << 20))                       # headroom
    vmem_limit = int(min(max(vmem_bytes, 32 << 20), 64 << 20))

    cost = pl.CostEstimate(
        flops=2 * M * K * N,
        transcendentals=0,
        bytes_accessed=(x2d.size * x2d.dtype.itemsize
                        + w.size * w.dtype.itemsize + N * 4
                        + M * N * out_itemsize))

    return pl.pallas_call(
        _linear_kernel,
        out_shape=jax.ShapeDtypeStruct((M, N), out_dtype),
        grid_spec=pltpu.PrefetchScalarGridSpec(
            num_scalar_prefetch=0,
            grid=(M // tm, K // tk),
            in_specs=[
                pl.BlockSpec((tm, tk), lambda i, k: (i, k)),
                pl.BlockSpec((tk, N), lambda i, k: (k, 0)),
                pl.BlockSpec((1, N), lambda i, k: (0, 0)),
            ],
            out_specs=pl.BlockSpec((tm, N), lambda i, k: (i, 0)),
            scratch_shapes=[pltpu.VMEM((tm, N), jnp.float32)],
        ),
        compiler_params=pltpu.CompilerParams(
            dimension_semantics=("parallel", "arbitrary"),
            vmem_limit_bytes=vmem_limit),
        cost_estimate=cost,
    )(x2d, w, b2)


# ---------------------------------------------------------------------------
# Flash-style causal attention over the fused QKV tensor.
#   qkv: (B, T, 3, H, hd) bf16.  Grid = (B, n_lower_tri_steps), with a
#   scalar-prefetched (qi, ki) schedule covering only lower-triangular tiles.
#   Online-softmax statistics and the accumulator live in f32 VMEM scratch.
#   Output is written lane-dense straight into a (B, T, C) array.
# ---------------------------------------------------------------------------
def _flash_kernel(qi_tbl, ki_tbl, q_ref, k_ref, v_ref, o_ref,
                  m_sc, l_sc, acc_sc, *, tq, tk, n_head, head_dim, scale):
    step = pl.program_id(1)
    qi = qi_tbl[step]
    ki = ki_tbl[step]

    @pl.when(ki == 0)
    def _init():
        m_sc[...] = jnp.full_like(m_sc, _NEG_INF)
        l_sc[...] = jnp.zeros_like(l_sc)
        acc_sc[...] = jnp.zeros_like(acc_sc)

    def attend(apply_mask):
        if apply_mask:
            # Only the diagonal tile needs masking; with qi == ki and
            # tq == tk the causal mask is the static lower-triangle.
            rows = jax.lax.broadcasted_iota(jnp.int32, (tq, tk), 0)
            cols = jax.lax.broadcasted_iota(jnp.int32, (tq, tk), 1)
            causal = cols <= rows
        for h in range(n_head):  # static unroll over heads
            q_h = q_ref[0, :, 0, h, :]                      # (tq, hd) bf16
            k_h = k_ref[0, :, 0, h, :]                      # (tk, hd) bf16
            v_h = v_ref[0, :, 0, h, :]                      # (tk, hd) bf16

            # Contract last dims on the MXU (no explicit k.T); scale in f32.
            score = jax.lax.dot_general(
                q_h, k_h, (((1,), (1,)), ((), ())),
                preferred_element_type=jnp.float32) * scale  # (tq, tk) f32
            if apply_mask:
                score = jnp.where(causal, score, _NEG_INF)

            m_prev = m_sc[:, h:h + 1]                        # (tq, 1) f32
            m_new = jnp.maximum(m_prev,
                                jnp.max(score, axis=-1, keepdims=True))
            alpha = jnp.exp(m_prev - m_new)
            p = jnp.exp(score - m_new)
            l_sc[:, h:h + 1] = alpha * l_sc[:, h:h + 1] + jnp.sum(
                p, axis=-1, keepdims=True)
            acc_sc[h] = alpha * acc_sc[h] + jnp.dot(
                p.astype(v_h.dtype), v_h, preferred_element_type=jnp.float32)
            m_sc[:, h:h + 1] = m_new

    @pl.when(ki < qi)
    def _interior():
        attend(apply_mask=False)

    @pl.when(ki == qi)
    def _diagonal():
        attend(apply_mask=True)
        # Diagonal tile is the last step of this q row: normalize and emit a
        # lane-dense (tq, C) slab (heads packed along lanes).
        for h in range(n_head):
            inv_l = pl.reciprocal(l_sc[:, h:h + 1], approx=True)  # EUP slot
            o_ref[0, :, h * head_dim:(h + 1) * head_dim] = (
                acc_sc[h] * inv_l).astype(o_ref.dtype)


def _flash_attention(qkv, *, scale):
    B, T, three, H, hd = qkv.shape
    assert three == 3
    C = H * hd
    tq = _pick_tile(T, (128, 64, 32, 16, 8))   # cap at 128 (vreg pressure)
    tk = tq
    nq = T // tq

    # Flattened lower-triangular (qi, ki) schedule: only needed tiles iterate.
    qis, kis = [], []
    for qi in range(nq):
        for ki in range(qi + 1):
            qis.append(qi)
            kis.append(ki)
    n_steps = len(qis)
    qi_tbl = jnp.asarray(qis, dtype=jnp.int32)
    ki_tbl = jnp.asarray(kis, dtype=jnp.int32)

    kernel = functools.partial(_flash_kernel, tq=tq, tk=tk,
                               n_head=H, head_dim=hd, scale=scale)

    cost = pl.CostEstimate(
        flops=4 * B * n_steps * H * tq * tk * hd,        # qk^T + p@v
        transcendentals=B * n_steps * H * tq * tk,       # exp
        bytes_accessed=(B * n_steps * (tq + 2 * tk) * C * qkv.dtype.itemsize
                        + B * T * C * 2))

    return pl.pallas_call(
        kernel,
        out_shape=jax.ShapeDtypeStruct((B, T, C), jnp.bfloat16),
        grid_spec=pltpu.PrefetchScalarGridSpec(
            num_scalar_prefetch=2,
            grid=(B, n_steps),
            in_specs=[
                # q / k / v sliced straight out of the fused QKV tensor.
                pl.BlockSpec((1, tq, 1, H, hd),
                             lambda b, s, qt, kt: (b, qt[s], 0, 0, 0)),
                pl.BlockSpec((1, tk, 1, H, hd),
                             lambda b, s, qt, kt: (b, kt[s], 1, 0, 0)),
                pl.BlockSpec((1, tk, 1, H, hd),
                             lambda b, s, qt, kt: (b, kt[s], 2, 0, 0)),
            ],
            out_specs=pl.BlockSpec((1, tq, C),
                                   lambda b, s, qt, kt: (b, qt[s], 0)),
            scratch_shapes=[
                pltpu.VMEM((tq, H), jnp.float32),       # running max per head
                pltpu.VMEM((tq, H), jnp.float32),       # running denom per head
                pltpu.VMEM((H, tq, hd), jnp.float32),   # output accumulator
            ],
        ),
        compiler_params=pltpu.CompilerParams(
            dimension_semantics=("parallel", "arbitrary")),
        cost_estimate=cost,
    )(qi_tbl, ki_tbl, qkv, qkv, qkv)


# ---------------------------------------------------------------------------
# Full module forward.
# ---------------------------------------------------------------------------
def causal_self_attention(x, w_qkv, b_qkv, w_proj, b_proj, n_head):
    """x: (B, T, C) float32. Weights stored (in, out). Returns (B, T, C)."""
    B, T, C = x.shape
    H = n_head
    hd = C // H

    # bf16 on the MXU; f32 accumulation / softmax statistics inside kernels.
    x_bf = x.reshape(B * T, C).astype(jnp.bfloat16)
    w_qkv_bf = w_qkv.astype(jnp.bfloat16)
    w_proj_bf = w_proj.astype(jnp.bfloat16)

    # QKV projection (fused); reshape to (B, T, 3, H, hd) is free.
    qkv = _linear(x_bf, w_qkv_bf, b_qkv, jnp.bfloat16)       # (B*T, 3C) bf16
    qkv = qkv.reshape(B, T, 3, H, hd)

    # Causal flash attention; the kernel reads q/k/v directly from the fused
    # tensor and writes (B, T, C), so there are no head split/merge transposes.
    y = _flash_attention(qkv, scale=1.0 / math.sqrt(hd))      # (B, T, C) bf16

    # Output projection (free reshape to (B*T, C)).
    y = _linear(y.reshape(B * T, C), w_proj_bf, b_proj, x.dtype)
    return y.reshape(B, T, C)


# ---------------------------------------------------------------------------
# Pure-JAX f32 reference matching the PyTorch module semantics.
# ---------------------------------------------------------------------------
def _reference(x, w_qkv, b_qkv, w_proj, b_proj, n_head):
    B, T, C = x.shape
    hd = C // n_head
    qkv = x @ w_qkv + b_qkv
    q, k, v = jnp.split(qkv, 3, axis=-1)

    def heads(t):
        return t.reshape(B, T, n_head, hd).transpose(0, 2, 1, 3)

    q, k, v = heads(q), heads(k), heads(v)
    s = jnp.einsum("bhqd,bhkd->bhqk", q, k) / math.sqrt(hd)
    mask = jnp.tril(jnp.ones((T, T), dtype=bool))
    s = jnp.where(mask, s, -jnp.inf)
    p = jax.nn.softmax(s, axis=-1)
    y = jnp.einsum("bhqk,bhkd->bhqd", p, v)
    y = y.transpose(0, 2, 1, 3).reshape(B, T, C)
    return y @ w_proj + b_proj


if __name__ == "__main__":
    # Small config that still exercises multiple q/k tiles, the diagonal
    # (masked) and interior (unmasked) branches, and the head unroll:
    # B=2, T=256, n_embed=128, n_head=4 (head_dim=32).
    B, T, C, n_head = 2, 256, 128, 4

    key = jax.random.PRNGKey(0)
    kx, k1, k2, k3, k4 = jax.random.split(key, 5)

    x = jax.random.normal(kx, (B, T, C), dtype=jnp.float32)
    # "Linear" parameters stored as (in, out) so y = x @ W + b.
    w_qkv = jax.random.normal(k1, (C, 3 * C), dtype=jnp.float32) * 0.02
    b_qkv = jax.random.normal(k2, (3 * C,), dtype=jnp.float32) * 0.02
    w_proj = jax.random.normal(k3, (C, C), dtype=jnp.float32) * 0.02
    b_proj = jax.random.normal(k4, (C,), dtype=jnp.float32) * 0.02

    y = causal_self_attention(x, w_qkv, b_qkv, w_proj, b_proj, n_head)
    y = jax.block_until_ready(y)

    y_ref = _reference(x, w_qkv, b_qkv, w_proj, b_proj, n_head)
    assert y.shape == (B, T, C)
    # bf16 MXU inputs + approx reciprocal -> looser tolerance than pure f32.
    assert jnp.allclose(y, y_ref, atol=2e-2, rtol=2e-2), "mismatch vs reference"

    print("KERNEL_OK")
</pallas_src>

<mosaic_0001>
module attributes {stable_mosaic.version = 11 : i64} {
  func.func @_linear_kernel(%arg0: i32, %arg1: i32, %arg2: memref<512x128xbf16, #tpu.memory_space<vmem>>, %arg3: memref<128x384xbf16, #tpu.memory_space<vmem>>, %arg4: memref<1x384xf32, #tpu.memory_space<vmem>>, %arg5: memref<512x384xbf16, #tpu.memory_space<vmem>>, %arg6: memref<512x384xf32, #tpu.memory_space<vmem>>) attributes {dimension_semantics = [#tpu.dimension_semantics<parallel>, #tpu.dimension_semantics<arbitrary>], iteration_bounds = array<i64: 1, 1>, scalar_prefetch = 0 : i64, scratch_operands = 1 : i64, tpu.core_type = #tpu.core_type<tc>, window_params = [{transform_indices = @transform_0, window_bounds = array<i64: 512, 128>}, {transform_indices = @transform_1, window_bounds = array<i64: 128, 384>}, {pipeline_mode = #tpu.pipeline_mode<synchronous>, transform_indices = @transform_2, window_bounds = array<i64: 1, 384>}, {transform_indices = @transform_3, window_bounds = array<i64: 512, 384>}]} {
    %c0_i32 = arith.constant 0 : i32
    %0 = arith.cmpi eq, %arg1, %c0_i32 : i32
    %1 = arith.extui %0 : i1 to i32
    %c0_i32_0 = arith.constant 0 : i32
    %2 = arith.cmpi ne, %1, %c0_i32_0 : i32
    scf.if %2 {
      %cst_10 = arith.constant 0.000000e+00 : f32
      %12 = vector.broadcast %cst_10 : f32 to vector<512x384xf32>
      %c0_11 = arith.constant 0 : index
      %c0_12 = arith.constant 0 : index
      %13 = vector.load %arg6[%c0_11, %c0_12] : memref<512x384xf32, #tpu.memory_space<vmem>>, vector<512x384xf32>
      tpu.vector_store %arg6[%c0_11, %c0_12], %12 {strides = array<i32>} : memref<512x384xf32, #tpu.memory_space<vmem>>, vector<512x384xf32>,
    } else {
    }
    %c0 = arith.constant 0 : index
    %c0_1 = arith.constant 0 : index
    %3 = vector.load %arg6[%c0, %c0_1] : memref<512x384xf32, #tpu.memory_space<vmem>>, vector<512x384xf32>
    %c0_2 = arith.constant 0 : index
    %c0_3 = arith.constant 0 : index
    %4 = vector.load %arg2[%c0_2, %c0_3] : memref<512x128xbf16, #tpu.memory_space<vmem>>, vector<512x128xbf16>
    %c0_4 = arith.constant 0 : index
    %c0_5 = arith.constant 0 : index
    %5 = vector.load %arg3[%c0_4, %c0_5] : memref<128x384xbf16, #tpu.memory_space<vmem>>, vector<128x384xbf16>
    %cst = arith.constant dense<0.000000e+00> : vector<512x384xf32>
    %6 = tpu.matmul %4, %5, %cst {dimension_numbers = #tpu.dot_dimension_numbers<[1], [0], [0], [1], [0, 0, 1, 1], [], []>} : vector<512x128xbf16>, vector<128x384xbf16>, vector<512x384xf32> -> vector<512x384xf32>
    %7 = arith.addf %3, %6 : vector<512x384xf32>
    %c0_6 = arith.constant 0 : index
    %c0_7 = arith.constant 0 : index
    %8 = vector.load %arg6[%c0_6, %c0_7] : memref<512x384xf32, #tpu.memory_space<vmem>>, vector<512x384xf32>
    tpu.vector_store %arg6[%c0_6, %c0_7], %7 {strides = array<i32>} : memref<512x384xf32, #tpu.memory_space<vmem>>, vector<512x384xf32>,
    %c0_i32_8 = arith.constant 0 : i32
    %9 = arith.cmpi eq, %arg1, %c0_i32_8 : i32
    %10 = arith.extui %9 : i1 to i32
    %c0_i32_9 = arith.constant 0 : i32
    %11 = arith.cmpi ne, %10, %c0_i32_9 : i32
    scf.if %11 {
      %c0_10 = arith.constant 0 : index
      %c0_11 = arith.constant 0 : index
      %12 = vector.load %arg6[%c0_10, %c0_11] : memref<512x384xf32, #tpu.memory_space<vmem>>, vector<512x384xf32>
      %c0_12 = arith.constant 0 : index
      %c0_13 = arith.constant 0 : index
      %13 = vector.load %arg4[%c0_12, %c0_13] : memref<1x384xf32, #tpu.memory_space<vmem>>, vector<1x384xf32>
      %14 = vector.broadcast %13 : vector<1x384xf32> to vector<512x384xf32>
      %15 = arith.addf %12, %14 : vector<512x384xf32>
      %16 = arith.truncf %15 : vector<512x384xf32> to vector<512x384xbf16>
      %c0_14 = arith.constant 0 : index
      %c0_15 = arith.constant 0 : index
      %17 = vector.load %arg5[%c0_14, %c0_15] : memref<512x384xbf16, #tpu.memory_space<vmem>>, vector<512x384xbf16>
      tpu.vector_store %arg5[%c0_14, %c0_15], %16 {strides = array<i32>} : memref<512x384xbf16, #tpu.memory_space<vmem>>, vector<512x384xbf16>,
    } else {
    }
    return
  }
  func.func @transform_0(%arg0: i32, %arg1: i32) -> (i32, i32) {
    %c0_i32 = arith.constant 0 : i32
    return %arg0, %arg1 : i32, i32
  }
  func.func @transform_1(%arg0: i32, %arg1: i32) -> (i32, i32) {
    %c0_i32 = arith.constant 0 : i32
    %c0_i32_0 = arith.constant 0 : i32
    return %arg1, %c0_i32 : i32, i32
  }
  func.func @transform_2(%arg0: i32, %arg1: i32) -> (i32, i32) {
    %c0_i32 = arith.constant 0 : i32
    %c0_i32_0 = arith.constant 0 : i32
    %c0_i32_1 = arith.constant 0 : i32
    return %c0_i32, %c0_i32_0 : i32, i32
  }
  func.func @transform_3(%arg0: i32, %arg1: i32) -> (i32, i32) {
    %c0_i32 = arith.constant 0 : i32
    %c0_i32_0 = arith.constant 0 : i32
    return %arg0, %c0_i32 : i32, i32
  }
}

</mosaic_0001>

<bundles_post_ra>
// kernel: tpu_custom_call.1
= control target key start
LH: loop header
LB: loop body
LE: loop exit
PB: predicated region body
PF: predicated region fallthrough
CT: control target
= control target key end

     0   :  { %8 = vsyncpa [#allocation4], 0  ;;  %s3972_s0 = inlined_call_operand.hbm [shape: bf16[512,128], index: 0, kind: input, shape index: {}]   ;;  %s3973_s1 = inlined_call_operand.hbm [shape: bf16[128,384], index: 1, kind: input, shape index: {}]   ;;  %s3974_s2 = inlined_call_operand.vmem [shape: f32[1,384], index: 2, kind: input, shape index: {}]   ;;  %s3975_s3 = inlined_call_operand.hbm [shape: bf16[512,384], index: 3, kind: output, shape index: {}]  }
   0x1   :  { %9 = vsyncpa [#allocation7], 0 }
   0x2   :  { %10 = vsyncpa [#allocation5], 0  ;;  %s3650_s12 = smov [#allocation3]  }
   0x3   :  { %s16_s13 = sshll.u32 %s3650_s12, 4  ;;  %s17_s13 = int_to_ptr.vmem [resolvable:$true] %s16_s13 }
   0x4   :  { %s3592_s14 = scalar_lea.vmem %s17_s13, 4096  ;;  %p3597_p1 = scmp.lt.s32.totalorder %s17_s13, %s17_s13 }
   0x5   :  { %p3593_p0 = scmp.ne.s32.totalorder %s17_s13, %s3592_s14  ;;  %p3598_p2 = scmp.lt.s32.totalorder %s3592_s14, %s3592_s14 }
   0x7   :  { %p3599_p3 = por %p3598_p2, %p3597_p1 }
   0x9   :  { %p3600_p4 = pnand %p3599_p3, %p3593_p0 }
   0xb   :  { %3603 = shalt.err (!%p3600_p4)
}
   0xc   :  { %s3651_s15 = smov 64   ;;  %s3652_s16 = smov 4  }
   0xd   :  { %22 = dma.hbm_to_vmem [thread:$0]  %s3972_s0, 4096, %s17_s13, [#allocation4], %s3651_s15, %s3651_s15, %s3652_s16  }
   0xe   :  { %s3653_s19 = smov [#allocation6]  }
   0xf   :  { %s28_s20 = sshll.u32 %s3653_s19, 4  ;;  %s29_s20 = int_to_ptr.vmem [resolvable:$true] %s28_s20 }
  0x10   :  { %s3612_s21 = scalar_lea.vmem %s29_s20, 3072  ;;  %p3617_p6 = scmp.lt.s32.totalorder %s29_s20, %s29_s20 }
  0x11   :  { %p3613_p5 = scmp.ne.s32.totalorder %s29_s20, %s3612_s21  ;;  %p3618_p7 = scmp.lt.s32.totalorder %s3612_s21, %s3612_s21 }
  0x13   :  { %p3619_p8 = por %p3618_p7, %p3617_p6 }
  0x15   :  { %p3620_p9 = pnand %p3619_p8, %p3613_p5 }
  0x17   :  { %3623 = shalt.err (!%p3620_p9)
}
  0x18   :  { %s3654_s22 = smov 192   ;;  %s3655_s23 = smov 12  }
  0x19   :  { %34 = dma.hbm_to_vmem [thread:$0]  %s3973_s1, 3072, %s29_s20, [#allocation7], %s3654_s22, %s3654_s22, %s3655_s23  }
  0x1a   :  { %3644 = dma.done.wait [#allocation4], 4096  }
  0x1b   :  { %3645 = vsyncadd [#allocation4], 4294963200 }
  0x1c   :  { %3646 = dma.done.wait [#allocation7], 3072  }
  0x1d   :  { %3647 = vsyncadd [#allocation7], 4294964224  ;;  %v3656_v0 = vmov 0   ;;  %v3520_v1 = vld [vmem:[#allocation6 + $0xac] ss:$12 sps:$4 sm:$0xff]   ;;  %v3689_v18 = vld [vmem:[#allocation3] sm:$0xff]   ;;  %v2071_v57 = vlaneseq }
  0x1e   :  { %880 = vmatprep.mubr.bf16.mxu0 %v3656_v0  ;;  %1120 = vmatprep.mubr.bf16.mxu1 %v3656_v0  ;;  %v3522_v2 = vld [vmem:[#allocation6 + $0xa8] ss:$12 sps:$4 sm:$0xff]   ;;  %v3525_v4 = vld [vmem:[#allocation6 + $0x90] ss:$12 sps:$4 sm:$0xff]   ;;  %v3528_v6 = vld [vmem:[#allocation6 + $0x78] ss:$12 sps:$4 sm:$0xff]  }
  0x1f   :  { %848 = vmatprep.subr.bf16.mxu0 %v3520_v1  ;;  %3496 = vmatprep.subr.bf16.mxu1 %v3520_v1  ;;  %v3523_v3 = vld [vmem:[#allocation6 + $0x94] ss:$12 sps:$4 sm:$0xff]   ;;  %v3526_v5 = vld [vmem:[#allocation6 + $0x7c] ss:$12 sps:$4 sm:$0xff]   ;;  %v3529_v7 = vld [vmem:[#allocation6 + $0x64] ss:$12 sps:$4 sm:$0xff]  }
  0x20   :  { %849 = vmatpush1.bf16.msra.mxu0 %v3522_v2  ;;  %3504 = vmatpush1.bf16.msra.mxu1 %v3522_v2  ;;  %v3531_v8 = vld [vmem:[#allocation6 + $0x60] ss:$12 sps:$4 sm:$0xff]   ;;  %v3534_v10 = vld [vmem:[#allocation6 + $0x48] ss:$12 sps:$4 sm:$0xff]   ;;  %v3537_v12 = vld [vmem:[#allocation6 + $0x30] ss:$12 sps:$4 sm:$0xff]  }
  0x21   :  { %850 = vmatprep.subr.bf16.mxu0 %v3523_v3  ;;  %3497 = vmatprep.subr.bf16.mxu1 %v3523_v3  ;;  %v3532_v9 = vld [vmem:[#allocation6 + $0x4c] ss:$12 sps:$4 sm:$0xff]   ;;  %v3535_v11 = vld [vmem:[#allocation6 + $0x34] ss:$12 sps:$4 sm:$0xff]   ;;  %v3538_v13 = vld [vmem:[#allocation6 + $0x1c] ss:$12 sps:$4 sm:$0xff]  }
  0x22   :  { %v3540_v14 = vld [vmem:[#allocation6 + $0x18] ss:$12 sps:$4 sm:$0xff]   ;;  %v3543_v16 = vld [vmem:[#allocation6] ss:$12 sps:$4 sm:$0xff]   ;;  %v3546_v17 = vld [vmem:[#allocation6 + $0xb0] ss:$12 sps:$4 sm:$0xff]  }
  0x23   :  { %v3541_v15 = vld [vmem:[#allocation6 + $0x4] ss:$12 sps:$4 sm:$0xff]   ;;  %v3552_v21 = vld [vmem:[#allocation6 + $0x80] ss:$12 sps:$4 sm:$0xff]   ;;  %v3555_v24 = vld [vmem:[#allocation6 + $0x68] ss:$12 sps:$4 sm:$0xff]  }
  0x24   :  { %851 = vmatpush1.bf16.msra.mxu0 %v3525_v4  ;;  %3505 = vmatpush1.bf16.msra.mxu1 %v3525_v4  ;;  %v3691_v19 = vld [vmem:[#allocation3 + $0xc0] sm:$0xff]   ;;  %v3547_v22 = vld [vmem:[#allocation3 + $0x8] sm:$0xff]   ;;  %v3550_v25 = vld [vmem:[#allocation3 + $0x10] sm:$0xff]   ;;  %v3754_v58 = vshrl.u32 %v2071_v57, 7 }
  0x25   :  { %852 = vmatprep.subr.bf16.mxu0 %v3526_v5  ;;  %3498 = vmatprep.subr.bf16.mxu1 %v3526_v5  ;;  %v3549_v20 = vld [vmem:[#allocation6 + $0x98] ss:$12 sps:$4 sm:$0xff]   ;;  %v3697_v23 = vld [vmem:[#allocation3 + $0xc8] sm:$0xff]   ;;  %v3558_v26 = vld [vmem:[#allocation6 + $0x50] ss:$12 sps:$4 sm:$0xff]  }
  0x26   :  { %v3702_v27 = vld [vmem:[#allocation3 + $0xd0] sm:$0xff]   ;;  %v3561_v28 = vld [vmem:[#allocation6 + $0x38] ss:$12 sps:$4 sm:$0xff]   ;;  %v3564_v29 = vld [vmem:[#allocation6 + $0x20] ss:$12 sps:$4 sm:$0xff]   ;;  %v2073_v59 = vsub.s32 0, %v3754_v58 }
  0x27   :  { %v3553_v30 = vld [vmem:[#allocation3 + $0x18] sm:$0xff]   ;;  %v3567_v32 = vld [vmem:[#allocation6 + $0x8] ss:$12 sps:$4 sm:$0xff]   ;;  %v3556_v33 = vld [vmem:[#allocation3 + $0x20] sm:$0xff]   ;;  %v2077_v60 = vsub.s32 1, %v3754_v58 }
  0x28   :  { %853 = vmatpush1.bf16.msra.mxu0 %v3528_v6  ;;  %3506 = vmatpush1.bf16.msra.mxu1 %v3528_v6  ;;  %v3707_v31 = vld [vmem:[#allocation3 + $0xd8] sm:$0xff]   ;;  %v3712_v34 = vld [vmem:[#allocation3 + $0xe0] sm:$0xff]   ;;  %v3559_v35 = vld [vmem:[#allocation3 + $0x28] sm:$0xff]  }
  0x29   :  { %854 = vmatprep.subr.bf16.mxu0 %v3529_v7  ;;  %3499 = vmatprep.subr.bf16.mxu1 %v3529_v7  ;;  %v3717_v36 = vld [vmem:[#allocation3 + $0xe8] sm:$0xff]   ;;  %v3562_v37 = vld [vmem:[#allocation3 + $0x30] sm:$0xff]   ;;  %v3565_v39 = vld [vmem:[#allocation3 + $0x38] sm:$0xff]  }
  0x2a   :  { %v3722_v38 = vld [vmem:[#allocation3 + $0xf0] sm:$0xff]   ;;  %v3727_v40 = vld [vmem:[#allocation3 + $0xf8] sm:$0xff]   ;;  %v3568_v41 = vld [vmem:[#allocation3 + $0x40] sm:$0xff]  }
  0x2b   :  { %v3569_v42 = vld [vmem:[#allocation3 + $0x48] sm:$0xff]   ;;  %v3570_v43 = vld [vmem:[#allocation3 + $0x50] sm:$0xff]   ;;  %v3571_v44 = vld [vmem:[#allocation3 + $0x58] sm:$0xff]  }
  0x2c   :  { %855 = vmatpush1.bf16.msra.mxu0 %v3531_v8  ;;  %3507 = vmatpush1.bf16.msra.mxu1 %v3531_v8  ;;  %v3572_v45 = vld [vmem:[#allocation3 + $0x60] sm:$0xff]   ;;  %v3573_v46 = vld [vmem:[#allocation3 + $0x68] sm:$0xff]   ;;  %v3574_v47 = vld [vmem:[#allocation3 + $0x70] sm:$0xff]  }
  0x2d   :  { %856 = vmatprep.subr.bf16.mxu0 %v3532_v9  ;;  %3500 = vmatprep.subr.bf16.mxu1 %v3532_v9  ;;  %v3575_v48 = vld [vmem:[#allocation3 + $0x78] sm:$0xff]   ;;  %v3576_v49 = vld [vmem:[#allocation3 + $0x80] sm:$0xff]   ;;  %v3577_v50 = vld [vmem:[#allocation3 + $0x88] sm:$0xff]  }
  0x2e   :  { %v3578_v51 = vld [vmem:[#allocation3 + $0x90] sm:$0xff]   ;;  %v3579_v52 = vld [vmem:[#allocation3 + $0x98] sm:$0xff]   ;;  %v3580_v53 = vld [vmem:[#allocation3 + $0xa0] sm:$0xff]  }
  0x2f   :  { %v3581_v54 = vld [vmem:[#allocation3 + $0xa8] sm:$0xff]   ;;  %v3582_v55 = vld [vmem:[#allocation3 + $0xb0] sm:$0xff]   ;;  %v3583_v56 = vld [vmem:[#allocation3 + $0xb8] sm:$0xff]  }
  0x30   :  { %857 = vmatpush1.bf16.msra.mxu0 %v3534_v10  ;;  %3508 = vmatpush1.bf16.msra.mxu1 %v3534_v10  ;;  %v3762_v61 = vld [vmem:[%s3974_s2] sm:$0x7]  ;;  %s3657_s2 = smov [#allocation8]  }
  0x31   :  { %858 = vmatprep.subr.bf16.mxu0 %v3535_v11  ;;  %3501 = vmatprep.subr.bf16.mxu1 %v3535_v11  ;;  %v3765_v62 = vrot.slane %v3762_v61, %v2073_v59  ;;  %v3768_v63 = vrot.slane %v3762_v61, %v2077_v60  ;;  %s3051_s26 = sshll.u32 %s3657_s2, 4  ;;  %s3052_s26 = int_to_ptr.vmem [resolvable:$true] %s3051_s26 }
  0x32   :  { %s3624_s27 = scalar_lea.vmem %s3052_s26, 12288  ;;  %p3629_p11 = scmp.lt.s32.totalorder %s3052_s26, %s3052_s26 }
  0x33   :  { %p3625_p10 = scmp.ne.s32.totalorder %s3052_s26, %s3624_s27  ;;  %p3630_p12 = scmp.lt.s32.totalorder %s3624_s27, %s3624_s27 }
  0x34   :  { %859 = vmatpush1.bf16.msra.mxu0 %v3537_v12  ;;  %3509 = vmatpush1.bf16.msra.mxu1 %v3537_v12 }
  0x35   :  { %860 = vmatprep.subr.bf16.mxu0 %v3538_v13  ;;  %3502 = vmatprep.subr.bf16.mxu1 %v3538_v13  ;;  %p3631_p13 = por %p3630_p12, %p3629_p11 }
  0x37   :  { %p3632_p0 = pnand %p3631_p13, %p3625_p10 }
  0x38   :  { %861 = vmatpush1.bf16.msra.mxu0 %v3540_v14  ;;  %3510 = vmatpush1.bf16.msra.mxu1 %v3540_v14 }
  0x39   :  { %862 = vmatprep.subr.bf16.mxu0 %v3541_v15  ;;  %3503 = vmatprep.subr.bf16.mxu1 %v3541_v15 }
  0x3c   :  { %863 = vmatpush1.bf16.msra.mxu0 %v3543_v16  ;;  %3511 = vmatpush1.bf16.msra.mxu1 %v3543_v16 }
  0x3d   :  { %3416 = vmatprep.subr.bf16.mxu1 %v3546_v17 }
  0x3f   :  { %881 = vmatmul.mubr.bf16.vlgmr.msra.gmra.mxu0 %v3689_v18  ;;  %1121 = vmatmul.mubr.bf16.vlgmr.msra.gmra.mxu1 %v3691_v19 }
  0x40   :  { %3417 = vmatpush3.bf16.msra.mxu1 %v3546_v17  ;;  %890 = vmatprep.mubr.bf16.mxu0 %v3656_v0 }
  0x41   :  { %1130 = vmatprep.mubr.bf16.mxu1 %v3656_v0  ;;  %3418 = vmatprep.subr.bf16.mxu1 %v3549_v20 }
  0x44   :  { %3419 = vmatpush3.bf16.msra.mxu1 %v3549_v20 }
  0x45   :  { %3420 = vmatprep.subr.bf16.mxu1 %v3552_v21 }
  0x47   :  { %891 = vmatmul.mubr.bf16.gmra.mxu0 %v3547_v22  ;;  %1131 = vmatmul.mubr.bf16.gmra.mxu1 %v3697_v23 }
  0x48   :  { %900 = vmatprep.mubr.bf16.mxu0 %v3656_v0  ;;  %1140 = vmatprep.mubr.bf16.mxu1 %v3656_v0 }
  0x49   :  { %3421 = vmatpush3.bf16.msra.mxu1 %v3552_v21 }
  0x4a   :  { %3422 = vmatprep.subr.bf16.mxu1 %v3555_v24 }
  0x4d   :  { %3423 = vmatpush3.bf16.msra.mxu1 %v3555_v24 }
  0x4e   :  { %3424 = vmatprep.subr.bf16.mxu1 %v3558_v26 }
  0x4f   :  { %901 = vmatmul.mubr.bf16.gmra.mxu0 %v3550_v25  ;;  %1141 = vmatmul.mubr.bf16.gmra.mxu1 %v3702_v27 }
  0x50   :  { %910 = vmatprep.mubr.bf16.mxu0 %v3656_v0  ;;  %1150 = vmatprep.mubr.bf16.mxu1 %v3656_v0 }
  0x51   :  { %3425 = vmatpush3.bf16.msra.mxu1 %v3558_v26 }
  0x52   :  { %3426 = vmatprep.subr.bf16.mxu1 %v3561_v28 }
  0x55   :  { %3427 = vmatpush3.bf16.msra.mxu1 %v3561_v28 }
  0x56   :  { %3428 = vmatprep.subr.bf16.mxu1 %v3564_v29 }
  0x57   :  { %911 = vmatmul.mubr.bf16.gmra.mxu0 %v3553_v30  ;;  %1151 = vmatmul.mubr.bf16.gmra.mxu1 %v3707_v31 }
  0x58   :  { %920 = vmatprep.mubr.bf16.mxu0 %v3656_v0  ;;  %1160 = vmatprep.mubr.bf16.mxu1 %v3656_v0 }
  0x59   :  { %3429 = vmatpush3.bf16.msra.mxu1 %v3564_v29 }
  0x5a   :  { %3430 = vmatprep.subr.bf16.mxu1 %v3567_v32 }
  0x5d   :  { %3431 = vmatpush3.bf16.msra.mxu1 %v3567_v32 }
  0x5f   :  { %921 = vmatmul.mubr.bf16.gmra.mxu0 %v3556_v33  ;;  %1161 = vmatmul.mubr.bf16.gmra.mxu1 %v3712_v34 }
  0x60   :  { %930 = vmatprep.mubr.bf16.mxu0 %v3656_v0  ;;  %1170 = vmatprep.mubr.bf16.mxu1 %v3656_v0 }
  0x67   :  { %931 = vmatmul.mubr.bf16.gmra.mxu0 %v3559_v35  ;;  %1171 = vmatmul.mubr.bf16.gmra.mxu1 %v3717_v36 }
  0x68   :  { %940 = vmatprep.mubr.bf16.mxu0 %v3656_v0  ;;  %1180 = vmatprep.mubr.bf16.mxu1 %v3656_v0 }
  0x6f   :  { %941 = vmatmul.mubr.bf16.gmra.mxu0 %v3562_v37  ;;  %1181 = vmatmul.mubr.bf16.gmra.mxu1 %v3722_v38 }
  0x70   :  { %950 = vmatprep.mubr.bf16.mxu0 %v3656_v0  ;;  %1190 = vmatprep.mubr.bf16.mxu1 %v3656_v0 }
  0x77   :  { %951 = vmatmul.mubr.bf16.gmra.mxu0 %v3565_v39  ;;  %1191 = vmatmul.mubr.bf16.gmra.mxu1 %v3727_v40 }
  0x78   :  { %960 = vmatprep.mubr.bf16.mxu0 %v3656_v0  ;;  %3432 = vmatprep.mubr.bf16.mxu1 %v3689_v18 }
  0x7f   :  { %961 = vmatmul.mubr.bf16.gmra.mxu0 %v3568_v41  ;;  %3433 = vmatmul.mubr.bf16.vlgmr.msra.gmra.mxu1 %v3547_v22 }
  0x80   :  { %970 = vmatprep.mubr.bf16.mxu0 %v3656_v0  ;;  %3436 = vmatprep.mubr.bf16.mxu1 %v3550_v25 }
  0x87   :  { %971 = vmatmul.mubr.bf16.gmra.mxu0 %v3569_v42  ;;  %3437 = vmatmul.mubr.bf16.gmra.mxu1 %v3553_v30 }
  0x88   :  { %980 = vmatprep.mubr.bf16.mxu0 %v3656_v0  ;;  %3440 = vmatprep.mubr.bf16.mxu1 %v3556_v33 }
  0x8f   :  { %981 = vmatmul.mubr.bf16.gmra.mxu0 %v3570_v43  ;;  %3441 = vmatmul.mubr.bf16.gmra.mxu1 %v3559_v35 }
  0x90   :  { %990 = vmatprep.mubr.bf16.mxu0 %v3656_v0  ;;  %3444 = vmatprep.mubr.bf16.mxu1 %v3562_v37 }
  0x97   :  { %991 = vmatmul.mubr.bf16.gmra.mxu0 %v3571_v44  ;;  %3445 = vmatmul.mubr.bf16.gmra.mxu1 %v3565_v39 }
  0x98   :  { %1000 = vmatprep.mubr.bf16.mxu0 %v3656_v0  ;;  %3448 = vmatprep.mubr.bf16.mxu1 %v3568_v41 }
  0x9f   :  { %1001 = vmatmul.mubr.bf16.gmra.mxu0 %v3572_v45  ;;  %3449 = vmatmul.mubr.bf16.gmra.mxu1 %v3569_v42 }
  0xa0   :  { %1010 = vmatprep.mubr.bf16.mxu0 %v3656_v0  ;;  %3452 = vmatprep.mubr.bf16.mxu1 %v3570_v43 }
  0xa7   :  { %1011 = vmatmul.mubr.bf16.gmra.mxu0 %v3573_v46  ;;  %3453 = vmatmul.mubr.bf16.gmra.mxu1 %v3571_v44 }
  0xa8   :  { %1020 = vmatprep.mubr.bf16.mxu0 %v3656_v0  ;;  %3456 = vmatprep.mubr.bf16.mxu1 %v3572_v45 }
  0xaf   :  { %1021 = vmatmul.mubr.bf16.gmra.mxu0 %v3574_v47  ;;  %3457 = vmatmul.mubr.bf16.gmra.mxu1 %v3573_v46 }
  0xb0   :  { %1030 = vmatprep.mubr.bf16.mxu0 %v3656_v0  ;;  %3460 = vmatprep.mubr.bf16.mxu1 %v3574_v47 }
  0xb7   :  { %1031 = vmatmul.mubr.bf16.gmra.mxu0 %v3575_v48  ;;  %3461 = vmatmul.mubr.bf16.gmra.mxu1 %v3575_v48 }
  0xb8   :  { %1040 = vmatprep.mubr.bf16.mxu0 %v3656_v0  ;;  %3464 = vmatprep.mubr.bf16.mxu1 %v3576_v49 }
  0xbf   :  { %1041 = vmatmul.mubr.bf16.gmra.mxu0 %v3576_v49  ;;  %3465 = vmatmul.mubr.bf16.gmra.mxu1 %v3577_v50 }
  0xc0   :  { %1050 = vmatprep.mubr.bf16.mxu0 %v3656_v0  ;;  %3468 = vmatprep.mubr.bf16.mxu1 %v3578_v51 }
  0xc7   :  { %1051 = vmatmul.mubr.bf16.gmra.mxu0 %v3577_v50  ;;  %3469 = vmatmul.mubr.bf16.gmra.mxu1 %v3579_v52 }
  0xc8   :  { %1060 = vmatprep.mubr.bf16.mxu0 %v3656_v0  ;;  %3472 = vmatprep.mubr.bf16.mxu1 %v3580_v53 }
  0xcf   :  { %1061 = vmatmul.mubr.bf16.gmra.mxu0 %v3578_v51  ;;  %3473 = vmatmul.mubr.bf16.gmra.mxu1 %v3581_v54 }
  0xd0   :  { %1070 = vmatprep.mubr.bf16.mxu0 %v3656_v0  ;;  %3476 = vmatprep.mubr.bf16.mxu1 %v3582_v55 }
  0xd7   :  { %1071 = vmatmul.mubr.bf16.gmra.mxu0 %v3579_v52  ;;  %3477 = vmatmul.mubr.bf16.gmra.mxu1 %v3583_v56 }
  0xd8   :  { %1080 = vmatprep.mubr.bf16.mxu0 %v3656_v0  ;;  %3480 = vmatprep.mubr.bf16.mxu1 %v3691_v19 }
  0xdf   :  { %1081 = vmatmul.mubr.bf16.gmra.mxu0 %v3580_v53  ;;  %3481 = vmatmul.mubr.bf16.gmra.mxu1 %v3697_v23 }
  0xe0   :  { %1090 = vmatprep.mubr.bf16.mxu0 %v3656_v0  ;;  %3484 = vmatprep.mubr.bf16.mxu1 %v3702_v27 }
  0xe7   :  { %1091 = vmatmul.mubr.bf16.gmra.mxu0 %v3581_v54  ;;  %3485 = vmatmul.mubr.bf16.gmra.mxu1 %v3707_v31 }
  0xe8   :  { %1100 = vmatprep.mubr.bf16.mxu0 %v3656_v0  ;;  %3488 = vmatprep.mubr.bf16.mxu1 %v3712_v34 }
  0xef   :  { %1101 = vmatmul.mubr.bf16.gmra.mxu0 %v3582_v55  ;;  %3489 = vmatmul.mubr.bf16.gmra.mxu1 %v3717_v36 }
  0xf0   :  { %1110 = vmatprep.mubr.bf16.mxu0 %v3656_v0  ;;  %3492 = vmatprep.mubr.bf16.mxu1 %v3722_v38 }
  0xf7   :  { %1111 = vmatmul.mubr.bf16.gmra.mxu0 %v3583_v56  ;;  %3493 = vmatmul.mubr.bf16.gmra.mxu1 %v3727_v40 }
  0xff   :  { %v882_v0 = vpop.f32.mrf.mxu0  ;;  %v1122_v1 = vpop.f32.mrf.mxu1 }
 0x100   :  { %v2086_v4 = vadd.f32 %v3765_v62, %v882_v0  ;;  %v2230_v5 = vadd.f32 %v3765_v62, %v1122_v1 }
 0x101   :  { %v884_v2 = vpop.f32.mrf.mxu0  ;;  %v1124_v3 = vpop.f32.mrf.mxu1 }
 0x102   :  { %v2087_v6 = vadd.f32 %v3768_v63, %v884_v2  ;;  %v2231_v7 = vadd.f32 %v3768_v63, %v1124_v3 }
 0x103   :  { %v886_v8 = vpop.f32.mrf.mxu0  ;;  %v1126_v9 = vpop.f32.mrf.mxu1 }
 0x104   :  { %v3248_v10 = vpack.c.bf16 %v2087_v6, %v2086_v4  ;;  %v3344_v11 = vpack.c.bf16 %v2231_v7, %v2230_v5  ;;  %v2089_v14 = vadd.f32 %v3765_v62, %v886_v8  ;;  %v2233_v15 = vadd.f32 %v3765_v62, %v1126_v9 }
 0x105   :  { %v888_v12 = vpop.f32.mrf.mxu0  ;;  %v1128_v13 = vpop.f32.mrf.mxu1 }
 0x106   :  { %2918 = vst [vmem:[#allocation8] sm:$0xff] %v3248_v10  ;;  %3014 = vst [vmem:[#allocation8 + $0x240] sm:$0xff] %v3344_v11  ;;  %v2090_v16 = vadd.f32 %v3768_v63, %v888_v12  ;;  %v2234_v17 = vadd.f32 %v3768_v63, %v1128_v13 }
 0x107   :  { %v892_v18 = vpop.f32.mrf.mxu0  ;;  %v1132_v19 = vpop.f32.mrf.mxu1 }
 0x108   :  { %v3250_v20 = vpack.c.bf16 %v2090_v16, %v2089_v14  ;;  %v3346_v21 = vpack.c.bf16 %v2234_v17, %v2233_v15  ;;  %v2092_v24 = vadd.f32 %v3765_v62, %v892_v18  ;;  %v2236_v25 = vadd.f32 %v3765_v62, %v1132_v19 }
 0x109   :  { %v894_v22 = vpop.f32.mrf.mxu0  ;;  %v1134_v23 = vpop.f32.mrf.mxu1 }
 0x10a   :  { %2920 = vst [vmem:[#allocation8 + $0xc] sm:$0xff] %v3250_v20  ;;  %3016 = vst [vmem:[#allocation8 + $0x24c] sm:$0xff] %v3346_v21  ;;  %v2093_v26 = vadd.f32 %v3768_v63, %v894_v22  ;;  %v2237_v27 = vadd.f32 %v3768_v63, %v1134_v23 }
 0x10b   :  { %v896_v28 = vpop.f32.mrf.mxu0  ;;  %v1136_v29 = vpop.f32.mrf.mxu1 }
 0x10c   :  { %v3252_v30 = vpack.c.bf16 %v2093_v26, %v2092_v24  ;;  %v3348_v31 = vpack.c.bf16 %v2237_v27, %v2236_v25  ;;  %v2095_v34 = vadd.f32 %v3765_v62, %v896_v28  ;;  %v2239_v35 = vadd.f32 %v3765_v62, %v1136_v29 }
 0x10d   :  { %v898_v32 = vpop.f32.mrf.mxu0  ;;  %v1138_v33 = vpop.f32.mrf.mxu1 }
 0x10e   :  { %2922 = vst [vmem:[#allocation8 + $0x18] sm:$0xff] %v3252_v30  ;;  %3018 = vst [vmem:[#allocation8 + $0x258] sm:$0xff] %v3348_v31  ;;  %v2096_v36 = vadd.f32 %v3768_v63, %v898_v32  ;;  %v2240_v37 = vadd.f32 %v3768_v63, %v1138_v33 }
 0x10f   :  { %v902_v38 = vpop.f32.mrf.mxu0  ;;  %v1142_v39 = vpop.f32.mrf.mxu1 }
 0x110   :  { %v3254_v40 = vpack.c.bf16 %v2096_v36, %v2095_v34  ;;  %v3350_v41 = vpack.c.bf16 %v2240_v37, %v2239_v35  ;;  %v2098_v44 = vadd.f32 %v3765_v62, %v902_v38  ;;  %v2242_v45 = vadd.f32 %v3765_v62, %v1142_v39 }
 0x111   :  { %v904_v42 = vpop.f32.mrf.mxu0  ;;  %v1144_v43 = vpop.f32.mrf.mxu1 }
 0x112   :  { %2924 = vst [vmem:[#allocation8 + $0x24] sm:$0xff] %v3254_v40  ;;  %3020 = vst [vmem:[#allocation8 + $0x264] sm:$0xff] %v3350_v41  ;;  %v2099_v46 = vadd.f32 %v3768_v63, %v904_v42  ;;  %v2243_v47 = vadd.f32 %v3768_v63, %v1144_v43 }
 0x113   :  { %v906_v48 = vpop.f32.mrf.mxu0  ;;  %v1146_v49 = vpop.f32.mrf.mxu1 }
 0x114   :  { %v3256_v50 = vpack.c.bf16 %v2099_v46, %v2098_v44  ;;  %v3352_v51 = vpack.c.bf16 %v2243_v47, %v2242_v45  ;;  %v2101_v54 = vadd.f32 %v3765_v62, %v906_v48  ;;  %v2245_v55 = vadd.f32 %v3765_v62, %v1146_v49 }
 0x115   :  { %v908_v52 = vpop.f32.mrf.mxu0  ;;  %v1148_v53 = vpop.f32.mrf.mxu1 }
 0x116   :  { %2926 = vst [vmem:[#allocation8 + $0x30] sm:$0xff] %v3256_v50  ;;  %3022 = vst [vmem:[#allocation8 + $0x270] sm:$0xff] %v3352_v51  ;;  %v2102_v56 = vadd.f32 %v3768_v63, %v908_v52  ;;  %v2246_v57 = vadd.f32 %v3768_v63, %v1148_v53 }
 0x117   :  { %v912_v59 = vpop.f32.mrf.mxu0  ;;  %v1152_v60 = vpop.f32.mrf.mxu1 }
 0x118   :  { %v3258_v0 = vpack.c.bf16 %v2102_v56, %v2101_v54  ;;  %v3354_v1 = vpack.c.bf16 %v2246_v57, %v2245_v55  ;;  %v2104_v4 = vadd.f32 %v3765_v62, %v912_v59  ;;  %v2248_v5 = vadd.f32 %v3765_v62, %v1152_v60 }
 0x119   :  { %v914_v2 = vpop.f32.mrf.mxu0  ;;  %v1154_v3 = vpop.f32.mrf.mxu1 }
 0x11a   :  { %2928 = vst [vmem:[#allocation8 + $0x3c] sm:$0xff] %v3258_v0  ;;  %3024 = vst [vmem:[#allocation8 + $0x27c] sm:$0xff] %v3354_v1  ;;  %v2105_v6 = vadd.f32 %v3768_v63, %v914_v2  ;;  %v2249_v7 = vadd.f32 %v3768_v63, %v1154_v3 }
 0x11b   :  { %v916_v8 = vpop.f32.mrf.mxu0  ;;  %v1156_v9 = vpop.f32.mrf.mxu1 }
 0x11c   :  { %v3260_v10 = vpack.c.bf16 %v2105_v6, %v2104_v4  ;;  %v3356_v11 = vpack.c.bf16 %v2249_v7, %v2248_v5  ;;  %v2107_v14 = vadd.f32 %v3765_v62, %v916_v8  ;;  %v2251_v15 = vadd.f32 %v3765_v62, %v1156_v9 }
 0x11d   :  { %v918_v12 = vpop.f32.mrf.mxu0  ;;  %v1158_v13 = vpop.f32.mrf.mxu1 }
 0x11e   :  { %2930 = vst [vmem:[#allocation8 + $0x48] sm:$0xff] %v3260_v10  ;;  %3026 = vst [vmem:[#allocation8 + $0x288] sm:$0xff] %v3356_v11  ;;  %v2108_v16 = vadd.f32 %v3768_v63, %v918_v12  ;;  %v2252_v17 = vadd.f32 %v3768_v63, %v1158_v13 }
 0x11f   :  { %v922_v18 = vpop.f32.mrf.mxu0  ;;  %v1162_v19 = vpop.f32.mrf.mxu1 }
 0x120   :  { %v3262_v20 = vpack.c.bf16 %v2108_v16, %v2107_v14  ;;  %v3358_v21 = vpack.c.bf16 %v2252_v17, %v2251_v15  ;;  %v2110_v24 = vadd.f32 %v3765_v62, %v922_v18  ;;  %v2254_v25 = vadd.f32 %v3765_v62, %v1162_v19 }
 0x121   :  { %v924_v22 = vpop.f32.mrf.mxu0  ;;  %v1164_v23 = vpop.f32.mrf.mxu1 }
 0x122   :  { %2932 = vst [vmem:[#allocation8 + $0x54] sm:$0xff] %v3262_v20  ;;  %3028 = vst [vmem:[#allocation8 + $0x294] sm:$0xff] %v3358_v21  ;;  %v2111_v26 = vadd.f32 %v3768_v63, %v924_v22  ;;  %v2255_v27 = vadd.f32 %v3768_v63, %v1164_v23  ;;  %v2081_v22 = vsub.s32 2, %v3754_v58 }
 0x123   :  { %v926_v28 = vpop.f32.mrf.mxu0  ;;  %v1166_v29 = vpop.f32.mrf.mxu1 }
 0x124   :  { %v3264_v30 = vpack.c.bf16 %v2111_v26, %v2110_v24  ;;  %v3360_v31 = vpack.c.bf16 %v2255_v27, %v2254_v25  ;;  %v2113_v34 = vadd.f32 %v3765_v62, %v926_v28  ;;  %v2257_v35 = vadd.f32 %v3765_v62, %v1166_v29 }
 0x125   :  { %v928_v32 = vpop.f32.mrf.mxu0  ;;  %v1168_v33 = vpop.f32.mrf.mxu1 }
 0x126   :  { %2934 = vst [vmem:[#allocation8 + $0x60] sm:$0xff] %v3264_v30  ;;  %3030 = vst [vmem:[#allocation8 + $0x2a0] sm:$0xff] %v3360_v31  ;;  %v2114_v36 = vadd.f32 %v3768_v63, %v928_v32  ;;  %v2258_v37 = vadd.f32 %v3768_v63, %v1168_v33  ;;  %v3832_v33 = vrot.slane %v3762_v61, %v2081_v22 }
 0x127   :  { %v932_v38 = vpop.f32.mrf.mxu0  ;;  %v1172_v39 = vpop.f32.mrf.mxu1 }
 0x128   :  { %v3266_v40 = vpack.c.bf16 %v2114_v36, %v2113_v34  ;;  %v3362_v41 = vpack.c.bf16 %v2258_v37, %v2257_v35  ;;  %v2116_v44 = vadd.f32 %v3765_v62, %v932_v38  ;;  %v2260_v45 = vadd.f32 %v3765_v62, %v1172_v39 }
 0x129   :  { %v934_v42 = vpop.f32.mrf.mxu0  ;;  %v1174_v43 = vpop.f32.mrf.mxu1 }
 0x12a   :  { %2936 = vst [vmem:[#allocation8 + $0x6c] sm:$0xff] %v3266_v40  ;;  %3032 = vst [vmem:[#allocation8 + $0x2ac] sm:$0xff] %v3362_v41  ;;  %v2117_v46 = vadd.f32 %v3768_v63, %v934_v42  ;;  %v2261_v47 = vadd.f32 %v3768_v63, %v1174_v43 }
 0x12b   :  { %v936_v48 = vpop.f32.mrf.mxu0  ;;  %v1176_v49 = vpop.f32.mrf.mxu1 }
 0x12c   :  { %v3268_v50 = vpack.c.bf16 %v2117_v46, %v2116_v44  ;;  %v3364_v51 = vpack.c.bf16 %v2261_v47, %v2260_v45  ;;  %v2119_v54 = vadd.f32 %v3765_v62, %v936_v48  ;;  %v2263_v55 = vadd.f32 %v3765_v62, %v1176_v49 }
 0x12d   :  { %v938_v52 = vpop.f32.mrf.mxu0  ;;  %v1178_v53 = vpop.f32.mrf.mxu1 }
 0x12e   :  { %2938 = vst [vmem:[#allocation8 + $0x78] sm:$0xff] %v3268_v50  ;;  %3034 = vst [vmem:[#allocation8 + $0x2b8] sm:$0xff] %v3364_v51  ;;  %v2120_v56 = vadd.f32 %v3768_v63, %v938_v52  ;;  %v2264_v57 = vadd.f32 %v3768_v63, %v1178_v53 }
 0x12f   :  { %v942_v59 = vpop.f32.mrf.mxu0  ;;  %v1182_v60 = vpop.f32.mrf.mxu1 }
 0x130   :  { %v3270_v0 = vpack.c.bf16 %v2120_v56, %v2119_v54  ;;  %v3366_v1 = vpack.c.bf16 %v2264_v57, %v2263_v55  ;;  %v2122_v4 = vadd.f32 %v3765_v62, %v942_v59  ;;  %v2266_v5 = vadd.f32 %v3765_v62, %v1182_v60 }
 0x131   :  { %v944_v2 = vpop.f32.mrf.mxu0  ;;  %v1184_v3 = vpop.f32.mrf.mxu1 }
 0x132   :  { %2940 = vst [vmem:[#allocation8 + $0x84] sm:$0xff] %v3270_v0  ;;  %3036 = vst [vmem:[#allocation8 + $0x2c4] sm:$0xff] %v3366_v1  ;;  %v2123_v6 = vadd.f32 %v3768_v63, %v944_v2  ;;  %v2267_v7 = vadd.f32 %v3768_v63, %v1184_v3 }
 0x133   :  { %v946_v8 = vpop.f32.mrf.mxu0  ;;  %v1186_v9 = vpop.f32.mrf.mxu1 }
 0x134   :  { %v3272_v10 = vpack.c.bf16 %v2123_v6, %v2122_v4  ;;  %v3368_v11 = vpack.c.bf16 %v2267_v7, %v2266_v5  ;;  %v2125_v14 = vadd.f32 %v3765_v62, %v946_v8  ;;  %v2269_v15 = vadd.f32 %v3765_v62, %v1186_v9 }
 0x135   :  { %v948_v12 = vpop.f32.mrf.mxu0  ;;  %v1188_v13 = vpop.f32.mrf.mxu1 }
 0x136   :  { %2942 = vst [vmem:[#allocation8 + $0x90] sm:$0xff] %v3272_v10  ;;  %3038 = vst [vmem:[#allocation8 + $0x2d0] sm:$0xff] %v3368_v11  ;;  %v2126_v16 = vadd.f32 %v3768_v63, %v948_v12  ;;  %v2270_v17 = vadd.f32 %v3768_v63, %v1188_v13 }
 0x137   :  { %v952_v18 = vpop.f32.mrf.mxu0  ;;  %v1192_v19 = vpop.f32.mrf.mxu1 }
 0x138   :  { %v3274_v20 = vpack.c.bf16 %v2126_v16, %v2125_v14  ;;  %v3370_v21 = vpack.c.bf16 %v2270_v17, %v2269_v15  ;;  %v2128_v25 = vadd.f32 %v3765_v62, %v952_v18  ;;  %v2272_v26 = vadd.f32 %v3765_v62, %v1192_v19 }
 0x139   :  { %v954_v23 = vpop.f32.mrf.mxu0  ;;  %v1194_v24 = vpop.f32.mrf.mxu1 }
 0x13a   :  { %2944 = vst [vmem:[#allocation8 + $0x9c] sm:$0xff] %v3274_v20  ;;  %3040 = vst [vmem:[#allocation8 + $0x2dc] sm:$0xff] %v3370_v21  ;;  %v2129_v27 = vadd.f32 %v3768_v63, %v954_v23  ;;  %v2273_v28 = vadd.f32 %v3768_v63, %v1194_v24 }
 0x13b   :  { %v956_v29 = vpop.f32.mrf.mxu0  ;;  %v1196_v30 = vpop.f32.mrf.mxu1 }
 0x13c   :  { %v3276_v31 = vpack.c.bf16 %v2129_v27, %v2128_v25  ;;  %v3372_v32 = vpack.c.bf16 %v2273_v28, %v2272_v26  ;;  %v2131_v35 = vadd.f32 %v3765_v62, %v956_v29  ;;  %v2275_v36 = vadd.f32 %v3765_v62, %v1196_v30 }
 0x13d   :  { %v958_v58 = vpop.f32.mrf.mxu0  ;;  %v1198_v34 = vpop.f32.mrf.mxu1 }
 0x13e   :  { %2946 = vst [vmem:[#allocation8 + $0xa8] sm:$0xff] %v3276_v31  ;;  %3042 = vst [vmem:[#allocation8 + $0x2e8] sm:$0xff] %v3372_v32  ;;  %v2132_v37 = vadd.f32 %v3768_v63, %v958_v58  ;;  %v2276_v38 = vadd.f32 %v3768_v63, %v1198_v34 }
 0x13f   :  { %v962_v39 = vpop.f32.mrf.mxu0  ;;  %v3434_v40 = vpop.f32.mrf.mxu1 }
 0x140   :  { %v3278_v41 = vpack.c.bf16 %v2132_v37, %v2131_v35  ;;  %v3374_v42 = vpack.c.bf16 %v2276_v38, %v2275_v36  ;;  %v2094_v43 = vadd.f32 %v3434_v40, %v3832_v33  ;;  %v2134_v45 = vadd.f32 %v3765_v62, %v962_v39 }
 0x141   :  { %v964_v61 = vpop.f32.mrf.mxu0  ;;  %v1235_v44 = vpop.f32.mrf.mxu1 }
 0x142   :  { %2948 = vst [vmem:[#allocation8 + $0xb4] sm:$0xff] %v3278_v41  ;;  %3044 = vst [vmem:[#allocation8 + $0x2f4] sm:$0xff] %v3374_v42  ;;  %v3253_v46 = vpack.c.bf16 %v2094_v43, %v2094_v43  ;;  %v2135_v47 = vadd.f32 %v3768_v63, %v964_v61  ;;  %v2088_v48 = vadd.f32 %v3832_v33, %v1235_v44 }
 0x143   :  { %v966_v49 = vpop.f32.mrf.mxu0  ;;  %v3435_v50 = vpop.f32.mrf.mxu1 }
 0x144   :  { %2923 = vst [vmem:[#allocation8 + $0x20] sm:$0xf] %v3253_v46  ;;  %v3280_v51 = vpack.c.bf16 %v2135_v47, %v2134_v45  ;;  %v3249_v52 = vpack.c.bf16 %v2088_v48, %v2088_v48  ;;  %v2097_v53 = vadd.f32 %v3435_v50, %v3832_v33  ;;  %v2137_v56 = vadd.f32 %v3765_v62, %v966_v49 }
 0x145   :  { %v968_v54 = vpop.f32.mrf.mxu0  ;;  %v1238_v55 = vpop.f32.mrf.mxu1 }
 0x146   :  { %2950 = vst [vmem:[#allocation8 + $0xc0] sm:$0xff] %v3280_v51  ;;  %2919 = vst [vmem:[#allocation8 + $0x8] sm:$0xf] %v3249_v52  ;;  %v3255_v57 = vpack.c.bf16 %v2097_v53, %v2097_v53  ;;  %v2138_v59 = vadd.f32 %v3768_v63, %v968_v54  ;;  %v2091_v60 = vadd.f32 %v3832_v33, %v1238_v55 }
 0x147   :  { %v972_v0 = vpop.f32.mrf.mxu0  ;;  %v3438_v1 = vpop.f32.mrf.mxu1 }
 0x148   :  { %2925 = vst [vmem:[#allocation8 + $0x2c] sm:$0xf] %v3255_v57  ;;  %v3282_v2 = vpack.c.bf16 %v2138_v59, %v2137_v56  ;;  %v3251_v3 = vpack.c.bf16 %v2091_v60, %v2091_v60  ;;  %v2106_v4 = vadd.f32 %v3438_v1, %v3832_v33  ;;  %v2140_v7 = vadd.f32 %v3765_v62, %v972_v0 }
 0x149   :  { %v974_v5 = vpop.f32.mrf.mxu0  ;;  %v1251_v6 = vpop.f32.mrf.mxu1 }
 0x14a   :  { %2952 = vst [vmem:[#allocation8 + $0xcc] sm:$0xff] %v3282_v2  ;;  %2921 = vst [vmem:[#allocation8 + $0x14] sm:$0xf] %v3251_v3  ;;  %v3261_v8 = vpack.c.bf16 %v2106_v4, %v2106_v4  ;;  %v2141_v9 = vadd.f32 %v3768_v63, %v974_v5  ;;  %v2100_v10 = vadd.f32 %v3832_v33, %v1251_v6 }
 0x14b   :  { %v976_v11 = vpop.f32.mrf.mxu0  ;;  %v3439_v12 = vpop.f32.mrf.mxu1 }
 0x14c   :  { %2931 = vst [vmem:[#allocation8 + $0x50] sm:$0xf] %v3261_v8  ;;  %v3284_v13 = vpack.c.bf16 %v2141_v9, %v2140_v7  ;;  %v3257_v14 = vpack.c.bf16 %v2100_v10, %v2100_v10  ;;  %v2109_v15 = vadd.f32 %v3439_v12, %v3832_v33  ;;  %v2143_v18 = vadd.f32 %v3765_v62, %v976_v11 }
 0x14d   :  { %v978_v16 = vpop.f32.mrf.mxu0  ;;  %v1254_v17 = vpop.f32.mrf.mxu1 }
 0x14e   :  { %2954 = vst [vmem:[#allocation8 + $0xd8] sm:$0xff] %v3284_v13  ;;  %2927 = vst [vmem:[#allocation8 + $0x38] sm:$0xf] %v3257_v14  ;;  %v3263_v19 = vpack.c.bf16 %v2109_v15, %v2109_v15  ;;  %v2144_v20 = vadd.f32 %v3768_v63, %v978_v16  ;;  %v2103_v21 = vadd.f32 %v3832_v33, %v1254_v17 }
 0x14f   :  { %v982_v22 = vpop.f32.mrf.mxu0  ;;  %v3442_v23 = vpop.f32.mrf.mxu1 }
 0x150   :  { %2933 = vst [vmem:[#allocation8 + $0x5c] sm:$0xf] %v3263_v19  ;;  %v3286_v24 = vpack.c.bf16 %v2144_v20, %v2143_v18  ;;  %v3259_v25 = vpack.c.bf16 %v2103_v21, %v2103_v21  ;;  %v2118_v26 = vadd.f32 %v3442_v23, %v3832_v33  ;;  %v2146_v29 = vadd.f32 %v3765_v62, %v982_v22 }
 0x151   :  { %v984_v27 = vpop.f32.mrf.mxu0  ;;  %v1267_v28 = vpop.f32.mrf.mxu1 }
 0x152   :  { %2956 = vst [vmem:[#allocation8 + $0xe4] sm:$0xff] %v3286_v24  ;;  %2929 = vst [vmem:[#allocation8 + $0x44] sm:$0xf] %v3259_v25  ;;  %v3269_v30 = vpack.c.bf16 %v2118_v26, %v2118_v26  ;;  %v2147_v31 = vadd.f32 %v3768_v63, %v984_v27  ;;  %v2112_v32 = vadd.f32 %v3832_v33, %v1267_v28 }
 0x153   :  { %v986_v58 = vpop.f32.mrf.mxu0  ;;  %v3443_v34 = vpop.f32.mrf.mxu1 }
 0x154   :  { %2939 = vst [vmem:[#allocation8 + $0x80] sm:$0xf] %v3269_v30  ;;  %v3288_v35 = vpack.c.bf16 %v2147_v31, %v2146_v29  ;;  %v3265_v36 = vpack.c.bf16 %v2112_v32, %v2112_v32  ;;  %v2121_v37 = vadd.f32 %v3443_v34, %v3832_v33  ;;  %v2149_v40 = vadd.f32 %v3765_v62, %v986_v58 }
 0x155   :  { %v988_v38 = vpop.f32.mrf.mxu0  ;;  %v1270_v39 = vpop.f32.mrf.mxu1 }
 0x156   :  { %2958 = vst [vmem:[#allocation8 + $0xf0] sm:$0xff] %v3288_v35  ;;  %2935 = vst [vmem:[#allocation8 + $0x68] sm:$0xf] %v3265_v36  ;;  %v3271_v41 = vpack.c.bf16 %v2121_v37, %v2121_v37  ;;  %v2150_v42 = vadd.f32 %v3768_v63, %v988_v38  ;;  %v2115_v43 = vadd.f32 %v3832_v33, %v1270_v39 }
 0x157   :  { %v992_v61 = vpop.f32.mrf.mxu0  ;;  %v3446_v44 = vpop.f32.mrf.mxu1 }
 0x158   :  { %2941 = vst [vmem:[#allocation8 + $0x8c] sm:$0xf] %v3271_v41  ;;  %v3290_v45 = vpack.c.bf16 %v2150_v42, %v2149_v40  ;;  %v3267_v46 = vpack.c.bf16 %v2115_v43, %v2115_v43  ;;  %v2130_v47 = vadd.f32 %v3446_v44, %v3832_v33  ;;  %v2152_v50 = vadd.f32 %v3765_v62, %v992_v61 }
 0x159   :  { %v994_v48 = vpop.f32.mrf.mxu0  ;;  %v1283_v49 = vpop.f32.mrf.mxu1 }
 0x15a   :  { %2960 = vst [vmem:[#allocation8 + $0xfc] sm:$0xff] %v3290_v45  ;;  %2937 = vst [vmem:[#allocation8 + $0x74] sm:$0xf] %v3267_v46  ;;  %v3277_v51 = vpack.c.bf16 %v2130_v47, %v2130_v47  ;;  %v2153_v52 = vadd.f32 %v3768_v63, %v994_v48  ;;  %v2124_v53 = vadd.f32 %v3832_v33, %v1283_v49 }
 0x15b   :  { %v996_v54 = vpop.f32.mrf.mxu0  ;;  %v3447_v55 = vpop.f32.mrf.mxu1 }
 0x15c   :  { %2947 = vst [vmem:[#allocation8 + $0xb0] sm:$0xf] %v3277_v51  ;;  %v3292_v56 = vpack.c.bf16 %v2153_v52, %v2152_v50  ;;  %v3273_v57 = vpack.c.bf16 %v2124_v53, %v2124_v53  ;;  %v2133_v59 = vadd.f32 %v3447_v55, %v3832_v33  ;;  %v2155_v1 = vadd.f32 %v3765_v62, %v996_v54 }
 0x15d   :  { %v998_v60 = vpop.f32.mrf.mxu0  ;;  %v1286_v0 = vpop.f32.mrf.mxu1 }
 0x15e   :  { %2962 = vst [vmem:[#allocation8 + $0x108] sm:$0xff] %v3292_v56  ;;  %2943 = vst [vmem:[#allocation8 + $0x98] sm:$0xf] %v3273_v57  ;;  %v3279_v2 = vpack.c.bf16 %v2133_v59, %v2133_v59  ;;  %v2156_v3 = vadd.f32 %v3768_v63, %v998_v60  ;;  %v2127_v4 = vadd.f32 %v3832_v33, %v1286_v0 }
 0x15f   :  { %v1002_v5 = vpop.f32.mrf.mxu0  ;;  %v3450_v6 = vpop.f32.mrf.mxu1 }
 0x160   :  { %2949 = vst [vmem:[#allocation8 + $0xbc] sm:$0xf] %v3279_v2  ;;  %v3294_v7 = vpack.c.bf16 %v2156_v3, %v2155_v1  ;;  %v3275_v8 = vpack.c.bf16 %v2127_v4, %v2127_v4  ;;  %v2142_v9 = vadd.f32 %v3450_v6, %v3832_v33  ;;  %v2158_v12 = vadd.f32 %v3765_v62, %v1002_v5 }
 0x161   :  { %v1004_v10 = vpop.f32.mrf.mxu0  ;;  %v1299_v11 = vpop.f32.mrf.mxu1 }
 0x162   :  { %2964 = vst [vmem:[#allocation8 + $0x114] sm:$0xff] %v3294_v7  ;;  %2945 = vst [vmem:[#allocation8 + $0xa4] sm:$0xf] %v3275_v8  ;;  %v3285_v13 = vpack.c.bf16 %v2142_v9, %v2142_v9  ;;  %v2159_v14 = vadd.f32 %v3768_v63, %v1004_v10  ;;  %v2136_v15 = vadd.f32 %v3832_v33, %v1299_v11 }
 0x163   :  { %v1006_v16 = vpop.f32.mrf.mxu0  ;;  %v3451_v17 = vpop.f32.mrf.mxu1 }
 0x164   :  { %2955 = vst [vmem:[#allocation8 + $0xe0] sm:$0xf] %v3285_v13  ;;  %v3296_v18 = vpack.c.bf16 %v2159_v14, %v2158_v12  ;;  %v3281_v19 = vpack.c.bf16 %v2136_v15, %v2136_v15  ;;  %v2145_v20 = vadd.f32 %v3451_v17, %v3832_v33  ;;  %v2161_v23 = vadd.f32 %v3765_v62, %v1006_v16 }
 0x165   :  { %v1008_v21 = vpop.f32.mrf.mxu0  ;;  %v1302_v22 = vpop.f32.mrf.mxu1 }
 0x166   :  { %2966 = vst [vmem:[#allocation8 + $0x120] sm:$0xff] %v3296_v18  ;;  %2951 = vst [vmem:[#allocation8 + $0xc8] sm:$0xf] %v3281_v19  ;;  %v3287_v24 = vpack.c.bf16 %v2145_v20, %v2145_v20  ;;  %v2162_v25 = vadd.f32 %v3768_v63, %v1008_v21  ;;  %v2139_v26 = vadd.f32 %v3832_v33, %v1302_v22 }
 0x167   :  { %v1012_v27 = vpop.f32.mrf.mxu0  ;;  %v3454_v28 = vpop.f32.mrf.mxu1 }
 0x168   :  { %2957 = vst [vmem:[#allocation8 + $0xec] sm:$0xf] %v3287_v24  ;;  %v3298_v29 = vpack.c.bf16 %v2162_v25, %v2161_v23  ;;  %v3283_v30 = vpack.c.bf16 %v2139_v26, %v2139_v26  ;;  %v2154_v31 = vadd.f32 %v3454_v28, %v3832_v33  ;;  %v2164_v34 = vadd.f32 %v3765_v62, %v1012_v27 }
 0x169   :  { %v1014_v32 = vpop.f32.mrf.mxu0  ;;  %v1315_v58 = vpop.f32.mrf.mxu1 }
 0x16a   :  { %2968 = vst [vmem:[#allocation8 + $0x12c] sm:$0xff] %v3298_v29  ;;  %2953 = vst [vmem:[#allocation8 + $0xd4] sm:$0xf] %v3283_v30  ;;  %v3293_v35 = vpack.c.bf16 %v2154_v31, %v2154_v31  ;;  %v2165_v36 = vadd.f32 %v3768_v63, %v1014_v32  ;;  %v2148_v37 = vadd.f32 %v3832_v33, %v1315_v58 }
 0x16b   :  { %v1016_v38 = vpop.f32.mrf.mxu0  ;;  %v3455_v39 = vpop.f32.mrf.mxu1 }
 0x16c   :  { %2963 = vst [vmem:[#allocation8 + $0x110] sm:$0xf] %v3293_v35  ;;  %v3300_v40 = vpack.c.bf16 %v2165_v36, %v2164_v34  ;;  %v3289_v41 = vpack.c.bf16 %v2148_v37, %v2148_v37  ;;  %v2157_v42 = vadd.f32 %v3455_v39, %v3832_v33  ;;  %v2167_v44 = vadd.f32 %v3765_v62, %v1016_v38 }
 0x16d   :  { %v1018_v43 = vpop.f32.mrf.mxu0  ;;  %v1318_v61 = vpop.f32.mrf.mxu1 }
 0x16e   :  { %2970 = vst [vmem:[#allocation8 + $0x138] sm:$0xff] %v3300_v40  ;;  %2959 = vst [vmem:[#allocation8 + $0xf8] sm:$0xf] %v3289_v41  ;;  %v3295_v45 = vpack.c.bf16 %v2157_v42, %v2157_v42  ;;  %v2168_v46 = vadd.f32 %v3768_v63, %v1018_v43  ;;  %v2151_v47 = vadd.f32 %v3832_v33, %v1318_v61 }
 0x16f   :  { %v1022_v48 = vpop.f32.mrf.mxu0  ;;  %v3458_v49 = vpop.f32.mrf.mxu1 }
 0x170   :  { %2965 = vst [vmem:[#allocation8 + $0x11c] sm:$0xf] %v3295_v45  ;;  %v3302_v50 = vpack.c.bf16 %v2168_v46, %v2167_v44  ;;  %v3291_v51 = vpack.c.bf16 %v2151_v47, %v2151_v47  ;;  %v2166_v52 = vadd.f32 %v3458_v49, %v3832_v33  ;;  %v2170_v55 = vadd.f32 %v3765_v62, %v1022_v48 }
 0x171   :  { %v1024_v53 = vpop.f32.mrf.mxu0  ;;  %v1331_v54 = vpop.f32.mrf.mxu1 }
 0x172   :  { %2972 = vst [vmem:[#allocation8 + $0x144] sm:$0xff] %v3302_v50  ;;  %2961 = vst [vmem:[#allocation8 + $0x104] sm:$0xf] %v3291_v51  ;;  %v3301_v56 = vpack.c.bf16 %v2166_v52, %v2166_v52  ;;  %v2171_v57 = vadd.f32 %v3768_v63, %v1024_v53  ;;  %v2160_v59 = vadd.f32 %v3832_v33, %v1331_v54 }
 0x173   :  { %v1026_v60 = vpop.f32.mrf.mxu0  ;;  %v3459_v0 = vpop.f32.mrf.mxu1 }
 0x174   :  { %2971 = vst [vmem:[#allocation8 + $0x140] sm:$0xf] %v3301_v56  ;;  %v3304_v1 = vpack.c.bf16 %v2171_v57, %v2170_v55  ;;  %v3297_v2 = vpack.c.bf16 %v2160_v59, %v2160_v59  ;;  %v2169_v3 = vadd.f32 %v3459_v0, %v3832_v33  ;;  %v2173_v6 = vadd.f32 %v3765_v62, %v1026_v60 }
 0x175   :  { %v1028_v4 = vpop.f32.mrf.mxu0  ;;  %v1334_v5 = vpop.f32.mrf.mxu1 }
 0x176   :  { %2974 = vst [vmem:[#allocation8 + $0x150] sm:$0xff] %v3304_v1  ;;  %2967 = vst [vmem:[#allocation8 + $0x128] sm:$0xf] %v3297_v2  ;;  %v3303_v7 = vpack.c.bf16 %v2169_v3, %v2169_v3  ;;  %v2174_v8 = vadd.f32 %v3768_v63, %v1028_v4  ;;  %v2163_v9 = vadd.f32 %v3832_v33, %v1334_v5 }
 0x177   :  { %v1032_v10 = vpop.f32.mrf.mxu0  ;;  %v3462_v11 = vpop.f32.mrf.mxu1 }
 0x178   :  { %2973 = vst [vmem:[#allocation8 + $0x14c] sm:$0xf] %v3303_v7  ;;  %v3306_v12 = vpack.c.bf16 %v2174_v8, %v2173_v6  ;;  %v3299_v13 = vpack.c.bf16 %v2163_v9, %v2163_v9  ;;  %v2178_v14 = vadd.f32 %v3462_v11, %v3832_v33  ;;  %v2176_v17 = vadd.f32 %v3765_v62, %v1032_v10 }
 0x179   :  { %v1034_v15 = vpop.f32.mrf.mxu0  ;;  %v1347_v16 = vpop.f32.mrf.mxu1 }
 0x17a   :  { %2976 = vst [vmem:[#allocation8 + $0x15c] sm:$0xff] %v3306_v12  ;;  %2969 = vst [vmem:[#allocation8 + $0x134] sm:$0xf] %v3299_v13  ;;  %v3309_v18 = vpack.c.bf16 %v2178_v14, %v2178_v14  ;;  %v2177_v19 = vadd.f32 %v3768_v63, %v1034_v15  ;;  %v2172_v20 = vadd.f32 %v3832_v33, %v1347_v16 }
 0x17b   :  { %v1036_v21 = vpop.f32.mrf.mxu0  ;;  %v3463_v22 = vpop.f32.mrf.mxu1 }
 0x17c   :  { %2979 = vst [vmem:[#allocation8 + $0x170] sm:$0xf] %v3309_v18  ;;  %v3308_v23 = vpack.c.bf16 %v2177_v19, %v2176_v17  ;;  %v3305_v24 = vpack.c.bf16 %v2172_v20, %v2172_v20  ;;  %v2181_v25 = vadd.f32 %v3463_v22, %v3832_v33  ;;  %v2179_v28 = vadd.f32 %v3765_v62, %v1036_v21 }
 0x17d   :  { %v1038_v26 = vpop.f32.mrf.mxu0  ;;  %v1350_v27 = vpop.f32.mrf.mxu1 }
 0x17e   :  { %2978 = vst [vmem:[#allocation8 + $0x168] sm:$0xff] %v3308_v23  ;;  %2975 = vst [vmem:[#allocation8 + $0x158] sm:$0xf] %v3305_v24  ;;  %v3311_v29 = vpack.c.bf16 %v2181_v25, %v2181_v25  ;;  %v2180_v30 = vadd.f32 %v3768_v63, %v1038_v26  ;;  %v2175_v31 = vadd.f32 %v3832_v33, %v1350_v27 }
 0x17f   :  { %v1042_v32 = vpop.f32.mrf.mxu0  ;;  %v3466_v58 = vpop.f32.mrf.mxu1 }
 0x180   :  { %2981 = vst [vmem:[#allocation8 + $0x17c] sm:$0xf] %v3311_v29  ;;  %v3310_v34 = vpack.c.bf16 %v2180_v30, %v2179_v28  ;;  %v3307_v35 = vpack.c.bf16 %v2175_v31, %v2175_v31  ;;  %v2190_v36 = vadd.f32 %v3466_v58, %v3832_v33  ;;  %v2182_v39 = vadd.f32 %v3765_v62, %v1042_v32 }
 0x181   :  { %v1044_v37 = vpop.f32.mrf.mxu0  ;;  %v1363_v38 = vpop.f32.mrf.mxu1 }
 0x182   :  { %2980 = vst [vmem:[#allocation8 + $0x174] sm:$0xff] %v3310_v34  ;;  %2977 = vst [vmem:[#allocation8 + $0x164] sm:$0xf] %v3307_v35  ;;  %v3317_v40 = vpack.c.bf16 %v2190_v36, %v2190_v36  ;;  %v2183_v41 = vadd.f32 %v3768_v63, %v1044_v37  ;;  %v2184_v42 = vadd.f32 %v3832_v33, %v1363_v38 }
 0x183   :  { %v1046_v43 = vpop.f32.mrf.mxu0  ;;  %v3467_v61 = vpop.f32.mrf.mxu1 }
 0x184   :  { %2987 = vst [vmem:[#allocation8 + $0x1a0] sm:$0xf] %v3317_v40  ;;  %v3312_v44 = vpack.c.bf16 %v2183_v41, %v2182_v39  ;;  %v3313_v45 = vpack.c.bf16 %v2184_v42, %v2184_v42  ;;  %v2193_v46 = vadd.f32 %v3467_v61, %v3832_v33  ;;  %v2185_v49 = vadd.f32 %v3765_v62, %v1046_v43 }
 0x185   :  { %v1048_v47 = vpop.f32.mrf.mxu0  ;;  %v1366_v48 = vpop.f32.mrf.mxu1 }
 0x186   :  { %2982 = vst [vmem:[#allocation8 + $0x180] sm:$0xff] %v3312_v44  ;;  %2983 = vst [vmem:[#allocation8 + $0x188] sm:$0xf] %v3313_v45  ;;  %v3319_v50 = vpack.c.bf16 %v2193_v46, %v2193_v46  ;;  %v2186_v51 = vadd.f32 %v3768_v63, %v1048_v47  ;;  %v2187_v52 = vadd.f32 %v3832_v33, %v1366_v48 }
 0x187   :  { %v1052_v53 = vpop.f32.mrf.mxu0  ;;  %v3470_v54 = vpop.f32.mrf.mxu1 }
 0x188   :  { %2989 = vst [vmem:[#allocation8 + $0x1ac] sm:$0xf] %v3319_v50  ;;  %v3314_v55 = vpack.c.bf16 %v2186_v51, %v2185_v49  ;;  %v3315_v56 = vpack.c.bf16 %v2187_v52, %v2187_v52  ;;  %v2202_v57 = vadd.f32 %v3470_v54, %v3832_v33  ;;  %v2188_v0 = vadd.f32 %v3765_v62, %v1052_v53 }
 0x189   :  { %v1054_v59 = vpop.f32.mrf.mxu0  ;;  %v1379_v60 = vpop.f32.mrf.mxu1 }
 0x18a   :  { %2984 = vst [vmem:[#allocation8 + $0x18c] sm:$0xff] %v3314_v55  ;;  %2985 = vst [vmem:[#allocation8 + $0x194] sm:$0xf] %v3315_v56  ;;  %v3325_v1 = vpack.c.bf16 %v2202_v57, %v2202_v57  ;;  %v2189_v2 = vadd.f32 %v3768_v63, %v1054_v59  ;;  %v2196_v3 = vadd.f32 %v3832_v33, %v1379_v60 }
 0x18b   :  { %v1056_v4 = vpop.f32.mrf.mxu0  ;;  %v3471_v5 = vpop.f32.mrf.mxu1 }
 0x18c   :  { %2995 = vst [vmem:[#allocation8 + $0x1d0] sm:$0xf] %v3325_v1  ;;  %v3316_v6 = vpack.c.bf16 %v2189_v2, %v2188_v0  ;;  %v3321_v7 = vpack.c.bf16 %v2196_v3, %v2196_v3  ;;  %v2205_v8 = vadd.f32 %v3471_v5, %v3832_v33  ;;  %v2191_v11 = vadd.f32 %v3765_v62, %v1056_v4 }
 0x18d   :  { %v1058_v9 = vpop.f32.mrf.mxu0  ;;  %v1382_v10 = vpop.f32.mrf.mxu1 }
 0x18e   :  { %2986 = vst [vmem:[#allocation8 + $0x198] sm:$0xff] %v3316_v6  ;;  %2991 = vst [vmem:[#allocation8 + $0x1b8] sm:$0xf] %v3321_v7  ;;  %v3327_v12 = vpack.c.bf16 %v2205_v8, %v2205_v8  ;;  %v2192_v13 = vadd.f32 %v3768_v63, %v1058_v9  ;;  %v2199_v14 = vadd.f32 %v3832_v33, %v1382_v10 }
 0x18f   :  { %v1062_v15 = vpop.f32.mrf.mxu0  ;;  %v3474_v16 = vpop.f32.mrf.mxu1 }
 0x190   :  { %2997 = vst [vmem:[#allocation8 + $0x1dc] sm:$0xf] %v3327_v12  ;;  %v3318_v17 = vpack.c.bf16 %v2192_v13, %v2191_v11  ;;  %v3323_v18 = vpack.c.bf16 %v2199_v14, %v2199_v14  ;;  %v2214_v19 = vadd.f32 %v3474_v16, %v3832_v33  ;;  %v2194_v22 = vadd.f32 %v3765_v62, %v1062_v15 }
 0x191   :  { %v1064_v20 = vpop.f32.mrf.mxu0  ;;  %v1395_v21 = vpop.f32.mrf.mxu1 }
 0x192   :  { %2988 = vst [vmem:[#allocation8 + $0x1a4] sm:$0xff] %v3318_v17  ;;  %2993 = vst [vmem:[#allocation8 + $0x1c4] sm:$0xf] %v3323_v18  ;;  %v3333_v23 = vpack.c.bf16 %v2214_v19, %v2214_v19  ;;  %v2195_v24 = vadd.f32 %v3768_v63, %v1064_v20  ;;  %v2208_v25 = vadd.f32 %v3832_v33, %v1395_v21 }
 0x193   :  { %v1066_v26 = vpop.f32.mrf.mxu0  ;;  %v3475_v27 = vpop.f32.mrf.mxu1 }
 0x194   :  { %3003 = vst [vmem:[#allocation8 + $0x200] sm:$0xf] %v3333_v23  ;;  %v3320_v28 = vpack.c.bf16 %v2195_v24, %v2194_v22  ;;  %v3329_v29 = vpack.c.bf16 %v2208_v25, %v2208_v25  ;;  %v2217_v30 = vadd.f32 %v3475_v27, %v3832_v33  ;;  %v2197_v58 = vadd.f32 %v3765_v62, %v1066_v26 }
 0x195   :  { %v1068_v31 = vpop.f32.mrf.mxu0  ;;  %v1398_v32 = vpop.f32.mrf.mxu1 }
 0x196   :  { %2990 = vst [vmem:[#allocation8 + $0x1b0] sm:$0xff] %v3320_v28  ;;  %2999 = vst [vmem:[#allocation8 + $0x1e8] sm:$0xf] %v3329_v29  ;;  %v3335_v34 = vpack.c.bf16 %v2217_v30, %v2217_v30  ;;  %v2198_v35 = vadd.f32 %v3768_v63, %v1068_v31  ;;  %v2211_v36 = vadd.f32 %v3832_v33, %v1398_v32 }
 0x197   :  { %v1072_v37 = vpop.f32.mrf.mxu0  ;;  %v3478_v38 = vpop.f32.mrf.mxu1 }
 0x198   :  { %3005 = vst [vmem:[#allocation8 + $0x20c] sm:$0xf] %v3335_v34  ;;  %v3322_v39 = vpack.c.bf16 %v2198_v35, %v2197_v58  ;;  %v3331_v40 = vpack.c.bf16 %v2211_v36, %v2211_v36  ;;  %v2226_v41 = vadd.f32 %v3478_v38, %v3832_v33  ;;  %v2200_v61 = vadd.f32 %v3765_v62, %v1072_v37 }
 0x199   :  { %v1074_v42 = vpop.f32.mrf.mxu0  ;;  %v1411_v43 = vpop.f32.mrf.mxu1 }
 0x19a   :  { %2992 = vst [vmem:[#allocation8 + $0x1bc] sm:$0xff] %v3322_v39  ;;  %3001 = vst [vmem:[#allocation8 + $0x1f4] sm:$0xf] %v3331_v40  ;;  %v3341_v44 = vpack.c.bf16 %v2226_v41, %v2226_v41  ;;  %v2201_v45 = vadd.f32 %v3768_v63, %v1074_v42  ;;  %v2220_v46 = vadd.f32 %v3832_v33, %v1411_v43 }
 0x19b   :  { %v1076_v47 = vpop.f32.mrf.mxu0  ;;  %v3479_v48 = vpop.f32.mrf.mxu1 }
 0x19c   :  { %3011 = vst [vmem:[#allocation8 + $0x230] sm:$0xf] %v3341_v44  ;;  %v3324_v49 = vpack.c.bf16 %v2201_v45, %v2200_v61  ;;  %v3337_v50 = vpack.c.bf16 %v2220_v46, %v2220_v46  ;;  %v2229_v51 = vadd.f32 %v3479_v48, %v3832_v33  ;;  %v2203_v54 = vadd.f32 %v3765_v62, %v1076_v47 }
 0x19d   :  { %v1078_v52 = vpop.f32.mrf.mxu0  ;;  %v1414_v53 = vpop.f32.mrf.mxu1 }
 0x19e   :  { %2994 = vst [vmem:[#allocation8 + $0x1c8] sm:$0xff] %v3324_v49  ;;  %3007 = vst [vmem:[#allocation8 + $0x218] sm:$0xf] %v3337_v50  ;;  %v3343_v55 = vpack.c.bf16 %v2229_v51, %v2229_v51  ;;  %v2204_v56 = vadd.f32 %v3768_v63, %v1078_v52  ;;  %v2223_v57 = vadd.f32 %v3832_v33, %v1414_v53 }
 0x19f   :  { %v1082_v59 = vpop.f32.mrf.mxu0  ;;  %v3482_v60 = vpop.f32.mrf.mxu1 }
 0x1a0   :  { %3013 = vst [vmem:[#allocation8 + $0x23c] sm:$0xf] %v3343_v55  ;;  %v3326_v0 = vpack.c.bf16 %v2204_v56, %v2203_v54  ;;  %v3339_v1 = vpack.c.bf16 %v2223_v57, %v2223_v57  ;;  %v2238_v2 = vadd.f32 %v3482_v60, %v3832_v33  ;;  %v2206_v5 = vadd.f32 %v3765_v62, %v1082_v59 }
 0x1a1   :  { %v1084_v3 = vpop.f32.mrf.mxu0  ;;  %v1427_v4 = vpop.f32.mrf.mxu1 }
 0x1a2   :  { %2996 = vst [vmem:[#allocation8 + $0x1d4] sm:$0xff] %v3326_v0  ;;  %3009 = vst [vmem:[#allocation8 + $0x224] sm:$0xf] %v3339_v1  ;;  %v3349_v6 = vpack.c.bf16 %v2238_v2, %v2238_v2  ;;  %v2207_v7 = vadd.f32 %v3768_v63, %v1084_v3  ;;  %v2232_v8 = vadd.f32 %v3832_v33, %v1427_v4 }
 0x1a3   :  { %v1086_v9 = vpop.f32.mrf.mxu0  ;;  %v3483_v10 = vpop.f32.mrf.mxu1 }
 0x1a4   :  { %3019 = vst [vmem:[#allocation8 + $0x260] sm:$0xf] %v3349_v6  ;;  %v3328_v11 = vpack.c.bf16 %v2207_v7, %v2206_v5  ;;  %v3345_v12 = vpack.c.bf16 %v2232_v8, %v2232_v8  ;;  %v2241_v13 = vadd.f32 %v3483_v10, %v3832_v33  ;;  %v2209_v16 = vadd.f32 %v3765_v62, %v1086_v9 }
 0x1a5   :  { %v1088_v14 = vpop.f32.mrf.mxu0  ;;  %v1430_v15 = vpop.f32.mrf.mxu1 }
 0x1a6   :  { %2998 = vst [vmem:[#allocation8 + $0x1e0] sm:$0xff] %v3328_v11  ;;  %3015 = vst [vmem:[#allocation8 + $0x248] sm:$0xf] %v3345_v12  ;;  %v3351_v17 = vpack.c.bf16 %v2241_v13, %v2241_v13  ;;  %v2210_v18 = vadd.f32 %v3768_v63, %v1088_v14  ;;  %v2235_v19 = vadd.f32 %v3832_v33, %v1430_v15 }
 0x1a7   :  { %v1092_v20 = vpop.f32.mrf.mxu0  ;;  %v3486_v21 = vpop.f32.mrf.mxu1 }
 0x1a8   :  { %3021 = vst [vmem:[#allocation8 + $0x26c] sm:$0xf] %v3351_v17  ;;  %v3330_v22 = vpack.c.bf16 %v2210_v18, %v2209_v16  ;;  %v3347_v23 = vpack.c.bf16 %v2235_v19, %v2235_v19  ;;  %v2250_v24 = vadd.f32 %v3486_v21, %v3832_v33  ;;  %v2212_v27 = vadd.f32 %v3765_v62, %v1092_v20 }
 0x1a9   :  { %v1094_v25 = vpop.f32.mrf.mxu0  ;;  %v1443_v26 = vpop.f32.mrf.mxu1 }
 0x1aa   :  { %3000 = vst [vmem:[#allocation8 + $0x1ec] sm:$0xff] %v3330_v22  ;;  %3017 = vst [vmem:[#allocation8 + $0x254] sm:$0xf] %v3347_v23  ;;  %v3357_v28 = vpack.c.bf16 %v2250_v24, %v2250_v24  ;;  %v2213_v29 = vadd.f32 %v3768_v63, %v1094_v25  ;;  %v2244_v30 = vadd.f32 %v3832_v33, %v1443_v26 }
 0x1ab   :  { %v1096_v31 = vpop.f32.mrf.mxu0  ;;  %v3487_v32 = vpop.f32.mrf.mxu1 }
 0x1ac   :  { %3027 = vst [vmem:[#allocation8 + $0x290] sm:$0xf] %v3357_v28  ;;  %v3332_v58 = vpack.c.bf16 %v2213_v29, %v2212_v27  ;;  %v3353_v34 = vpack.c.bf16 %v2244_v30, %v2244_v30  ;;  %v2253_v35 = vadd.f32 %v3487_v32, %v3832_v33  ;;  %v2215_v38 = vadd.f32 %v3765_v62, %v1096_v31 }
 0x1ad   :  { %v1098_v36 = vpop.f32.mrf.mxu0  ;;  %v1446_v37 = vpop.f32.mrf.mxu1 }
 0x1ae   :  { %3002 = vst [vmem:[#allocation8 + $0x1f8] sm:$0xff] %v3332_v58  ;;  %3023 = vst [vmem:[#allocation8 + $0x278] sm:$0xf] %v3353_v34  ;;  %v3359_v39 = vpack.c.bf16 %v2253_v35, %v2253_v35  ;;  %v2216_v40 = vadd.f32 %v3768_v63, %v1098_v36  ;;  %v2247_v41 = vadd.f32 %v3832_v33, %v1446_v37 }
 0x1af   :  { %v1102_v42 = vpop.f32.mrf.mxu0  ;;  %v3490_v43 = vpop.f32.mrf.mxu1 }
 0x1b0   :  { %3029 = vst [vmem:[#allocation8 + $0x29c] sm:$0xf] %v3359_v39  ;;  %v3334_v61 = vpack.c.bf16 %v2216_v40, %v2215_v38  ;;  %v3355_v44 = vpack.c.bf16 %v2247_v41, %v2247_v41  ;;  %v2262_v45 = vadd.f32 %v3490_v43, %v3832_v33  ;;  %v2218_v48 = vadd.f32 %v3765_v62, %v1102_v42 }
 0x1b1   :  { %v1104_v46 = vpop.f32.mrf.mxu0  ;;  %v1459_v47 = vpop.f32.mrf.mxu1 }
 0x1b2   :  { %3004 = vst [vmem:[#allocation8 + $0x204] sm:$0xff] %v3334_v61  ;;  %3025 = vst [vmem:[#allocation8 + $0x284] sm:$0xf] %v3355_v44  ;;  %v3365_v49 = vpack.c.bf16 %v2262_v45, %v2262_v45  ;;  %v2219_v50 = vadd.f32 %v3768_v63, %v1104_v46  ;;  %v2256_v51 = vadd.f32 %v3832_v33, %v1459_v47 }
 0x1b3   :  { %v1106_v52 = vpop.f32.mrf.mxu0  ;;  %v3491_v53 = vpop.f32.mrf.mxu1 }
 0x1b4   :  { %3035 = vst [vmem:[#allocation8 + $0x2c0] sm:$0xf] %v3365_v49  ;;  %v3336_v54 = vpack.c.bf16 %v2219_v50, %v2218_v48  ;;  %v3361_v55 = vpack.c.bf16 %v2256_v51, %v2256_v51  ;;  %v2265_v56 = vadd.f32 %v3491_v53, %v3832_v33  ;;  %v2221_v60 = vadd.f32 %v3765_v62, %v1106_v52 }
 0x1b5   :  { %v1108_v57 = vpop.f32.mrf.mxu0  ;;  %v1462_v59 = vpop.f32.mrf.mxu1 }
 0x1b6   :  { %3006 = vst [vmem:[#allocation8 + $0x210] sm:$0xff] %v3336_v54  ;;  %3031 = vst [vmem:[#allocation8 + $0x2a8] sm:$0xf] %v3361_v55  ;;  %v3367_v0 = vpack.c.bf16 %v2265_v56, %v2265_v56  ;;  %v2222_v1 = vadd.f32 %v3768_v63, %v1108_v57  ;;  %v2259_v2 = vadd.f32 %v3832_v33, %v1462_v59 }
 0x1b7   :  { %v1112_v3 = vpop.f32.mrf.mxu0  ;;  %v3494_v4 = vpop.f32.mrf.mxu1 }
 0x1b8   :  { %3037 = vst [vmem:[#allocation8 + $0x2cc] sm:$0xf] %v3367_v0  ;;  %v3338_v5 = vpack.c.bf16 %v2222_v1, %v2221_v60  ;;  %v3363_v6 = vpack.c.bf16 %v2259_v2, %v2259_v2  ;;  %v2274_v7 = vadd.f32 %v3494_v4, %v3832_v33  ;;  %v2224_v10 = vadd.f32 %v3765_v62, %v1112_v3 }
 0x1b9   :  { %v1114_v8 = vpop.f32.mrf.mxu0  ;;  %v1475_v9 = vpop.f32.mrf.mxu1 }
 0x1ba   :  { %3008 = vst [vmem:[#allocation8 + $0x21c] sm:$0xff] %v3338_v5  ;;  %3033 = vst [vmem:[#allocation8 + $0x2b4] sm:$0xf] %v3363_v6  ;;  %v3373_v11 = vpack.c.bf16 %v2274_v7, %v2274_v7  ;;  %v2225_v12 = vadd.f32 %v3768_v63, %v1114_v8  ;;  %v2268_v13 = vadd.f32 %v3832_v33, %v1475_v9 }
 0x1bb   :  { %v1116_v14 = vpop.f32.mrf.mxu0  ;;  %v3495_v15 = vpop.f32.mrf.mxu1 }
 0x1bc   :  { %3043 = vst [vmem:[#allocation8 + $0x2f0] sm:$0xf] %v3373_v11  ;;  %v3340_v16 = vpack.c.bf16 %v2225_v12, %v2224_v10  ;;  %v3369_v17 = vpack.c.bf16 %v2268_v13, %v2268_v13  ;;  %v2277_v18 = vadd.f32 %v3495_v15, %v3832_v33  ;;  %v2227_v21 = vadd.f32 %v3765_v62, %v1116_v14 }
 0x1bd   :  { %v1118_v19 = vpop.f32.mrf.mxu0  ;;  %v1478_v20 = vpop.f32.mrf.mxu1 }
 0x1be   :  { %3010 = vst [vmem:[#allocation8 + $0x228] sm:$0xff] %v3340_v16  ;;  %3039 = vst [vmem:[#allocation8 + $0x2d8] sm:$0xf] %v3369_v17  ;;  %v3375_v22 = vpack.c.bf16 %v2277_v18, %v2277_v18  ;;  %v2228_v23 = vadd.f32 %v3768_v63, %v1118_v19  ;;  %v2271_v24 = vadd.f32 %v3832_v33, %v1478_v20 }
 0x1c0   :  { %3045 = vst [vmem:[#allocation8 + $0x2fc] sm:$0xf] %v3375_v22  ;;  %v3342_v25 = vpack.c.bf16 %v2228_v23, %v2227_v21  ;;  %v3371_v26 = vpack.c.bf16 %v2271_v24, %v2271_v24 }
 0x1c2   :  { %3012 = vst [vmem:[#allocation8 + $0x234] sm:$0xff] %v3342_v25  ;;  %3041 = vst [vmem:[#allocation8 + $0x2e4] sm:$0xf] %v3371_v26 }
 0x1c3   :  { %3635 = shalt.err (!%p3632_p0)
}
 0x1c4   :  { %3057 = dma.vmem_to_hbm [thread:$0]  %s3052_s26, 12288, %s3975_s3, [#allocation5], %s3654_s22, %s3654_s22, %s3655_s23  }
 0x1c5   :  { %3648 = dma.done.wait [#allocation5], 12288  }
 0x1c6   :  { %3649 = vsyncadd [#allocation5], 4294955008 }
 0x1c7   :  { %3061 = vsyncpa [#allocation4], 1 }
 0x1c8   :  { %3062 = vsyncpa [#allocation7], 1 }
 0x1c9   :  { %3063 = vsyncpa [#allocation5], 1 }

</bundles_post_ra>
